<compile_context>
chip_gen: v7x
topology: tpu7x:2x2x1
jax: 0.10.0
libtpu: 0.0.40
codegen_flags: <defaults>
</compile_context>

<pallas_src>
import itertools
import numpy as np
import jax
import jax.numpy as jnp
from jax.experimental import pallas as pl
from jax.experimental.pallas import tpu as pltpu

FEAT_DIMS = 32          # args.feat_dims
M = 2025                # plane: 45 x 45 folding grid


def foldnet_kernel(pts_ref, wstack_ref, slab_ref, out_ref):
    """One batch step; activations are channels-first (C, m_pad)."""
    slab = slab_ref[0]                    # (F, 16) per-batch packed params
    cb1 = slab[:, 0:1]                    # (F, 1)  W1a_x @ cw + b1a
    cb2 = slab[:, 1:2]                    # (F, 1)  W2a_x @ cw + W2a_f @ b1c + b2a
    b1b = slab[:, 2:3]                    # (F, 1)
    b2b = slab[:, 3:4]                    # (F, 1)
    b2c = slab[0:3, 4:5]                  # (3, 1)
    w1ap = slab[:, 8:16]                  # (F, 8)  W1a_p padded (cols 2:8 zero)

    pts = pts_ref[...]                    # (8, Tm) grid, rows 2:8 zero

    # folding1 layer 1: relu(W1a_p @ pts + W1a_x @ cw + b1a)
    h = jnp.maximum(
        jnp.dot(w1ap, pts, preferred_element_type=jnp.float32) + cb1, 0.0)
    # folding1 layer 2
    h = jnp.maximum(
        jnp.dot(wstack_ref[0], h, preferred_element_type=jnp.float32) + b1b, 0.0)
    # folding1 layer 3 fused with folding2 layer 1 (no nonlinearity in between):
    #   relu(W2a_f @ (W1c @ h + b1c) + W2a_x @ cw + b2a) == relu(Wf @ h + cb2)
    h = jnp.maximum(
        jnp.dot(wstack_ref[1], h, preferred_element_type=jnp.float32) + cb2, 0.0)
    # folding2 layer 2
    h = jnp.maximum(
        jnp.dot(wstack_ref[2], h, preferred_element_type=jnp.float32) + b2b, 0.0)
    # folding2 layer 3 (W2c zero-padded to (F,F); keep first 3 rows) -> (3, Tm)
    o = jnp.dot(wstack_ref[3], h, preferred_element_type=jnp.float32)
    out_ref[0] = o[0:3, :] + b2c


@jax.jit
def foldnet_decoder_forward(x, points, params):
    """x: (B, 1, F) codeword; points: (m, 2) plane grid; returns (B, m, 3)."""
    W1a, b1a, W1b, b1b, W1c, b1c, W2a, b2a, W2b, b2b, W2c, b2c = params
    B, _, F = x.shape
    m = points.shape[0]
    m_pad = ((m + 127) // 128) * 128              # 2025 -> 2048; single m tile

    cw = x[:, 0, :].astype(jnp.float32)           # (B, F)
    W1a_x, W1a_p = W1a[:, :F], W1a[:, F:]         # (F, F), (F, 2)
    W2a_x, W2a_f = W2a[:, :F], W2a[:, F:]         # (F, F), (F, 3)

    # Per-batch bias columns: tiny (B,F)@(F,F) matvecs hoisted to XLA.
    cb1 = cw @ W1a_x.T + b1a[None, :]                          # (B, F)
    cb2 = cw @ W2a_x.T + (W2a_f @ b1c + b2a)[None, :]          # (B, F)

    # Fold folding1's last conv into folding2's first conv (no ReLU between).
    Wf = W2a_f @ W1c                                           # (F, F)

    # Consolidated weight stack: W1b, Wf, W2b, W2c (zero-padded to (F,F)).
    wstack = jnp.zeros((4, F, F), jnp.float32)
    wstack = wstack.at[0].set(W1b).at[1].set(Wf).at[2].set(W2b)
    wstack = wstack.at[3, :3, :].set(W2c)

    # Per-batch packed slab: bias columns + layer biases + W1a_p (broadcast over B).
    slab = jnp.zeros((B, F, 16), jnp.float32)
    slab = slab.at[:, :, 0].set(cb1)
    slab = slab.at[:, :, 1].set(cb2)
    slab = slab.at[:, :, 2].set(jnp.broadcast_to(b1b[None, :], (B, F)))
    slab = slab.at[:, :, 3].set(jnp.broadcast_to(b2b[None, :], (B, F)))
    slab = slab.at[:, :3, 4].set(jnp.broadcast_to(b2c[None, :], (B, 3)))
    slab = slab.at[:, :, 8:10].set(jnp.broadcast_to(W1a_p[None], (B, F, 2)))

    # Point grid, channels-first, padded to 8 sublanes / m_pad lanes (zeros).
    pts_cf = jnp.zeros((8, m_pad), jnp.float32).at[:2, :m].set(points.T)

    out_cf = pl.pallas_call(
        foldnet_kernel,
        out_shape=jax.ShapeDtypeStruct((B, 3, m_pad), jnp.float32),
        grid=(B,),
        in_specs=[
            pl.BlockSpec((8, m_pad), lambda b: (0, 0)),        # point grid (shared)
            pl.BlockSpec((4, F, F), lambda b: (0, 0, 0)),      # weight stack (shared)
            pl.BlockSpec((1, F, 16), lambda b: (b, 0, 0)),     # per-batch slab
        ],
        out_specs=pl.BlockSpec((1, 3, m_pad), lambda b: (b, 0, 0)),
        compiler_params=pltpu.CompilerParams(
            dimension_semantics=("parallel",)),
    )(pts_cf, wstack, slab)

    # Crop the m padding and do the final (B, m, 3) transpose in XLA (fused in jit).
    return jnp.transpose(out_cf[:, :, :m], (0, 2, 1))


def reference_forward(x, points, params):
    """Plain-JAX transcription of the PyTorch forward (channels-first)."""
    W1a, b1a, W1b, b1b, W1c, b1c, W2a, b2a, W2b, b2b, W2c, b2c = params
    B = x.shape[0]
    m = points.shape[0]
    xr = jnp.repeat(jnp.transpose(x, (0, 2, 1)), m, axis=2)      # (B, F, m)
    pts = jnp.repeat(points.T[None], B, axis=0)                  # (B, 2, m)

    def conv(w, b, t):  # 1x1 Conv1d
        return jnp.einsum('oi,bim->bom', w, t) + b[None, :, None]

    h = jax.nn.relu(conv(W1a, b1a, jnp.concatenate([xr, pts], axis=1)))
    h = jax.nn.relu(conv(W1b, b1b, h))
    f1 = conv(W1c, b1c, h)
    h = jax.nn.relu(conv(W2a, b2a, jnp.concatenate([xr, f1], axis=1)))
    h = jax.nn.relu(conv(W2b, b2b, h))
    f2 = conv(W2c, b2c, h)
    return jnp.transpose(f2, (0, 2, 1))                          # (B, m, 3)


if __name__ == "__main__":
    key = jax.random.PRNGKey(0)
    B, F = 2, FEAT_DIMS
    keys = jax.random.split(key, 16)

    def w_init(k, cout, cin):
        return jax.random.normal(k, (cout, cin), jnp.float32) / np.sqrt(cin)

    def b_init(k, cout):
        return jax.random.normal(k, (cout,), jnp.float32) * 0.1

    # PyTorch-convention parameters: Conv1d weight (Cout, Cin), bias (Cout,)
    W1a = w_init(keys[0], F, F + 2); b1a = b_init(keys[1], F)
    W1b = w_init(keys[2], F, F);     b1b = b_init(keys[3], F)
    W1c = w_init(keys[4], 3, F);     b1c = b_init(keys[5], 3)
    W2a = w_init(keys[6], F, F + 3); b2a = b_init(keys[7], F)
    W2b = w_init(keys[8], F, F);     b2b = b_init(keys[9], F)
    W2c = w_init(keys[10], 3, F);    b2c = b_init(keys[11], 3)
    params = (W1a, b1a, W1b, b1b, W1c, b1c, W2a, b2a, W2b, b2b, W2c, b2c)

    # Input codeword, as fed to FoldNet_Decoder: (B, 1, feat_dims)
    x = jax.random.normal(keys[12], (B, 1, F), jnp.float32)

    # Plane folding grid: itertools.product(linspace, linspace) -> (m, 2)
    # TODO(synk): 'sphere'/'gaussian' shapes need Shapes/*.npy; only 'plane' here.
    n = int(np.sqrt(M))
    lin = np.linspace(-1.0, 1.0, n)
    points = jnp.asarray(np.array(list(itertools.product(lin, lin))),
                         dtype=jnp.float32)                       # (M, 2)

    out = foldnet_decoder_forward(x, points, params)
    out = jax.block_until_ready(out)
    assert out.shape == (B, M, 3)

    ref = reference_forward(x, points, params)
    np.testing.assert_allclose(np.asarray(out), np.asarray(ref),
                               rtol=3e-4, atol=3e-4)

    print("KERNEL_OK")
</pallas_src>

<mosaic_0001>
module attributes {stable_mosaic.version = 11 : i64} {
  func.func @foldnet_kernel(%arg0: i32, %arg1: memref<8x2048xf32, #tpu.memory_space<vmem>>, %arg2: memref<4x32x32xf32, #tpu.memory_space<vmem>>, %arg3: memref<1x32x16xf32, #tpu.memory_space<vmem>>, %arg4: memref<1x3x2048xf32, #tpu.memory_space<vmem>>) attributes {dimension_semantics = [#tpu.dimension_semantics<parallel>], iteration_bounds = array<i64: 2>, scalar_prefetch = 0 : i64, scratch_operands = 0 : i64, tpu.core_type = #tpu.core_type<tc>, window_params = [{pipeline_mode = #tpu.pipeline_mode<synchronous>, transform_indices = @transform_0, window_bounds = array<i64: 8, 2048>}, {pipeline_mode = #tpu.pipeline_mode<synchronous>, transform_indices = @transform_1, window_bounds = array<i64: 4, 32, 32>}, {transform_indices = @transform_2, window_bounds = array<i64: 1, 32, 16>}, {transform_indices = @transform_3, window_bounds = array<i64: 1, 3, 2048>}]} {
    %c0 = arith.constant 0 : index
    %c0_0 = arith.constant 0 : index
    %c0_1 = arith.constant 0 : index
    %0 = vector.load %arg3[%c0, %c0_0, %c0_1] : memref<1x32x16xf32, #tpu.memory_space<vmem>>, vector<1x32x16xf32>
    %1 = vector.shape_cast %0 : vector<1x32x16xf32> to vector<32x16xf32>
    %2 = vector.extract_strided_slice %1 {offsets = [0, 0], sizes = [32, 1], strides = [1, 1]} : vector<32x16xf32> to vector<32x1xf32>
    %3 = vector.extract_strided_slice %1 {offsets = [0, 1], sizes = [32, 1], strides = [1, 1]} : vector<32x16xf32> to vector<32x1xf32>
    %4 = vector.extract_strided_slice %1 {offsets = [0, 2], sizes = [32, 1], strides = [1, 1]} : vector<32x16xf32> to vector<32x1xf32>
    %5 = vector.extract_strided_slice %1 {offsets = [0, 3], sizes = [32, 1], strides = [1, 1]} : vector<32x16xf32> to vector<32x1xf32>
    %6 = vector.extract_strided_slice %1 {offsets = [0, 4], sizes = [3, 1], strides = [1, 1]} : vector<32x16xf32> to vector<3x1xf32>
    %7 = vector.extract_strided_slice %1 {offsets = [0, 8], sizes = [32, 8], strides = [1, 1]} : vector<32x16xf32> to vector<32x8xf32>
    %c0_2 = arith.constant 0 : index
    %c0_3 = arith.constant 0 : index
    %8 = vector.load %arg1[%c0_2, %c0_3] : memref<8x2048xf32, #tpu.memory_space<vmem>>, vector<8x2048xf32>
    %cst = arith.constant dense<0.000000e+00> : vector<32x2048xf32>
    %9 = tpu.matmul %7, %8, %cst {dimension_numbers = #tpu.dot_dimension_numbers<[1], [0], [0], [1], [0, 0, 1, 1], [], []>} : vector<32x8xf32>, vector<8x2048xf32>, vector<32x2048xf32> -> vector<32x2048xf32>
    %10 = vector.broadcast %2 : vector<32x1xf32> to vector<32x2048xf32>
    %11 = arith.addf %9, %10 : vector<32x2048xf32>
    %cst_4 = arith.constant 0.000000e+00 : f32
    %12 = vector.broadcast %cst_4 : f32 to vector<32x2048xf32>
    %13 = arith.maximumf %11, %12 : vector<32x2048xf32>
    %c0_5 = arith.constant 0 : index
    %c0_6 = arith.constant 0 : index
    %c0_7 = arith.constant 0 : index
    %14 = vector.load %arg2[%c0_5, %c0_6, %c0_7] : memref<4x32x32xf32, #tpu.memory_space<vmem>>, vector<1x32x32xf32>
    %15 = vector.shape_cast %14 : vector<1x32x32xf32> to vector<32x32xf32>
    %cst_8 = arith.constant dense<0.000000e+00> : vector<32x2048xf32>
    %16 = tpu.matmul %15, %13, %cst_8 {dimension_numbers = #tpu.dot_dimension_numbers<[1], [0], [0], [1], [0, 0, 1, 1], [], []>} : vector<32x32xf32>, vector<32x2048xf32>, vector<32x2048xf32> -> vector<32x2048xf32>
    %17 = vector.broadcast %4 : vector<32x1xf32> to vector<32x2048xf32>
    %18 = arith.addf %16, %17 : vector<32x2048xf32>
    %cst_9 = arith.constant 0.000000e+00 : f32
    %19 = vector.broadcast %cst_9 : f32 to vector<32x2048xf32>
    %20 = arith.maximumf %18, %19 : vector<32x2048xf32>
    %c1 = arith.constant 1 : index
    %c0_10 = arith.constant 0 : index
    %c0_11 = arith.constant 0 : index
    %21 = vector.load %arg2[%c1, %c0_10, %c0_11] : memref<4x32x32xf32, #tpu.memory_space<vmem>>, vector<1x32x32xf32>
    %22 = vector.shape_cast %21 : vector<1x32x32xf32> to vector<32x32xf32>
    %cst_12 = arith.constant dense<0.000000e+00> : vector<32x2048xf32>
    %23 = tpu.matmul %22, %20, %cst_12 {dimension_numbers = #tpu.dot_dimension_numbers<[1], [0], [0], [1], [0, 0, 1, 1], [], []>} : vector<32x32xf32>, vector<32x2048xf32>, vector<32x2048xf32> -> vector<32x2048xf32>
    %24 = vector.broadcast %3 : vector<32x1xf32> to vector<32x2048xf32>
    %25 = arith.addf %23, %24 : vector<32x2048xf32>
    %cst_13 = arith.constant 0.000000e+00 : f32
    %26 = vector.broadcast %cst_13 : f32 to vector<32x2048xf32>
    %27 = arith.maximumf %25, %26 : vector<32x2048xf32>
    %c2 = arith.constant 2 : index
    %c0_14 = arith.constant 0 : index
    %c0_15 = arith.constant 0 : index
    %28 = vector.load %arg2[%c2, %c0_14, %c0_15] : memref<4x32x32xf32, #tpu.memory_space<vmem>>, vector<1x32x32xf32>
    %29 = vector.shape_cast %28 : vector<1x32x32xf32> to vector<32x32xf32>
    %cst_16 = arith.constant dense<0.000000e+00> : vector<32x2048xf32>
    %30 = tpu.matmul %29, %27, %cst_16 {dimension_numbers = #tpu.dot_dimension_numbers<[1], [0], [0], [1], [0, 0, 1, 1], [], []>} : vector<32x32xf32>, vector<32x2048xf32>, vector<32x2048xf32> -> vector<32x2048xf32>
    %31 = vector.broadcast %5 : vector<32x1xf32> to vector<32x2048xf32>
    %32 = arith.addf %30, %31 : vector<32x2048xf32>
    %cst_17 = arith.constant 0.000000e+00 : f32
    %33 = vector.broadcast %cst_17 : f32 to vector<32x2048xf32>
    %34 = arith.maximumf %32, %33 : vector<32x2048xf32>
    %c3 = arith.constant 3 : index
    %c0_18 = arith.constant 0 : index
    %c0_19 = arith.constant 0 : index
    %35 = vector.load %arg2[%c3, %c0_18, %c0_19] : memref<4x32x32xf32, #tpu.memory_space<vmem>>, vector<1x32x32xf32>
    %36 = vector.shape_cast %35 : vector<1x32x32xf32> to vector<32x32xf32>
    %cst_20 = arith.constant dense<0.000000e+00> : vector<32x2048xf32>
    %37 = tpu.matmul %36, %34, %cst_20 {dimension_numbers = #tpu.dot_dimension_numbers<[1], [0], [0], [1], [0, 0, 1, 1], [], []>} : vector<32x32xf32>, vector<32x2048xf32>, vector<32x2048xf32> -> vector<32x2048xf32>
    %38 = vector.extract_strided_slice %37 {offsets = [0, 0], sizes = [3, 2048], strides = [1, 1]} : vector<32x2048xf32> to vector<3x2048xf32>
    %39 = vector.broadcast %6 : vector<3x1xf32> to vector<3x2048xf32>
    %40 = arith.addf %38, %39 : vector<3x2048xf32>
    %c0_21 = arith.constant 0 : index
    %c0_22 = arith.constant 0 : index
    %c0_23 = arith.constant 0 : index
    %41 = vector.load %arg4[%c0_21, %c0_22, %c0_23] : memref<1x3x2048xf32, #tpu.memory_space<vmem>>, vector<1x3x2048xf32>
    %42 = vector.shape_cast %41 : vector<1x3x2048xf32> to vector<3x2048xf32>
    %43 = vector.shape_cast %40 : vector<3x2048xf32> to vector<1x3x2048xf32>
    tpu.vector_store %arg4[%c0_21, %c0_22, %c0_23], %43 {strides = array<i32>} : memref<1x3x2048xf32, #tpu.memory_space<vmem>>, vector<1x3x2048xf32>,
    return
  }
  func.func @transform_0(%arg0: i32) -> (i32, i32) {
    %c0_i32 = arith.constant 0 : i32
    %c0_i32_0 = arith.constant 0 : i32
    %c0_i32_1 = arith.constant 0 : i32
    return %c0_i32, %c0_i32_0 : i32, i32
  }
  func.func @transform_1(%arg0: i32) -> (i32, i32, i32) {
    %c0_i32 = arith.constant 0 : i32
    %c0_i32_0 = arith.constant 0 : i32
    %c0_i32_1 = arith.constant 0 : i32
    %c0_i32_2 = arith.constant 0 : i32
    return %c0_i32, %c0_i32_0, %c0_i32_1 : i32, i32, i32
  }
  func.func @transform_2(%arg0: i32) -> (i32, i32, i32) {
    %c0_i32 = arith.constant 0 : i32
    %c0_i32_0 = arith.constant 0 : i32
    %c0_i32_1 = arith.constant 0 : i32
    return %arg0, %c0_i32, %c0_i32_0 : i32, i32, i32
  }
  func.func @transform_3(%arg0: i32) -> (i32, i32, i32) {
    %c0_i32 = arith.constant 0 : i32
    %c0_i32_0 = arith.constant 0 : i32
    %c0_i32_1 = arith.constant 0 : i32
    return %arg0, %c0_i32, %c0_i32_0 : i32, i32, i32
  }
}

</mosaic_0001>

<bundles_post_ra>
// kernel: foldnet_decoder_forward.1
= control target key start
LH: loop header
LB: loop body
LE: loop exit
PB: predicated region body
PF: predicated region fallthrough
CT: control target
= control target key end

     0   :  { %s4731_s12 = smov 0   ;;  %s5722_s0 = inlined_call_operand.vmem [shape: f32[8,2048], index: 0, kind: input, shape index: {}]   ;;  %s5723_s1 = inlined_call_operand.vmem [shape: f32[4,32,32], index: 1, kind: input, shape index: {}]   ;;  %s5724_s2 = inlined_call_operand.vmem [shape: f32[2,32,16], index: 2, kind: input, shape index: {}]   ;;  %s5725_s3 = inlined_call_operand.vmem [shape: f32[2,3,2048], index: 3, kind: output, shape index: {}]  }
   0x1 LB: > { %s4227_s13 = sadd.s32 4294967295, %s4702_s12   ;;  %p4231_p0 = scmp.ge.s32.totalorder %s4702_s12, 1  ;;  %s4702_s12 = sphi %s4731_s12, %s13_s12  }
   0x2   : > { %p137_p1 = scmp.lt.s32.totalorder %s4702_s12, 3 }
   0x4   : > { %p138_p2 = pnand %p4231_p0, %p137_p1 }
   0x5   : > { %p161_p3 = scmp.lt.s32.totalorder (!%p138_p2), %s4227_s13, 1  ;;  %v176_v0 = vld [vmem:[%s5722_s0 + $0x8] sm:$0xff] (!%p138_p2)  ;;  %v178_v1 = vld [vmem:[%s5722_s0 + $0x18] sm:$0xff] (!%p138_p2)  ;;  %v175_v2 = vld [vmem:[%s5722_s0] sm:$0xff] (!%p138_p2)  ;;  %v4704_v6 = vmov (!%p138_p2), 0.0   ;;  %s4705_s30 = smov (!%p138_p2), 120  }
   0x6   : > { %141 = sbr.rel (%p138_p2) target bundleno = 1350 (0x546), region = 32  ;;  %228 = vmatprep.subr.mxu0 (!%p138_p2), %v176_v0  ;;  %317 = vmatprep.subr.mxu1 (!%p138_p2), %v178_v1  ;;  %v177_v3 = vld [vmem:[%s5722_s0 + $0x10] sm:$0xff] (!%p138_p2)  ;;  %v180_v4 = vld [vmem:[%s5722_s0 + $0x28] sm:$0xff] (!%p138_p2)  ;;  %v182_v5 = vld [vmem:[%s5722_s0 + $0x38] sm:$0xff] (!%p138_p2)  ;;  %v4706_v11 = vmov (!%p138_p2), 0   ;;  %vm219_vm0 = vcmask (!%p138_p2), 64512  }
   0x7   : > { %229 = vmatpush1.msra.mxu0 (!%p138_p2), %v175_v2  ;;  %292 = vmatprep.mubr.f32.mxu0 (!%p138_p2), %v4704_v6  ;;  %v179_v13 = vld [vmem:[%s5722_s0 + $0x20] sm:$0xff] (!%p138_p2)  ;;  %v181_v14 = vld [vmem:[%s5722_s0 + $0x30] sm:$0xff] (!%p138_p2)  ;;  %v184_v15 = vld [vmem:[%s5722_s0 + $0x48] sm:$0xff] (!%p138_p2)  ;;  %v4707_v26 = vmov (!%p138_p2), 2   ;;  %vm1024_vm1 = vcmask (!%p138_p2), 261120  }
   0x8   : > { %318 = vmatpush1.msra.mxu1 (!%p138_p2), %v177_v3  ;;  %381 = vmatprep.mubr.f32.mxu1 (!%p138_p2), %v4704_v6  ;;  %v186_v16 = vld [vmem:[%s5722_s0 + $0x58] sm:$0xff] (!%p138_p2)  ;;  %v183_v20 = vld [vmem:[%s5722_s0 + $0x40] sm:$0xff] (!%p138_p2)  ;;  %v185_v21 = vld [vmem:[%s5722_s0 + $0x50] sm:$0xff] (!%p138_p2) }
   0x9   : > { %406 = vmatprep.subr.mxu0 (!%p138_p2), %v180_v4  ;;  %495 = vmatprep.subr.mxu1 (!%p138_p2), %v182_v5  ;;  %v188_v22 = vld [vmem:[%s5722_s0 + $0x68] sm:$0xff] (!%p138_p2)  ;;  %v190_v23 = vld [vmem:[%s5722_s0 + $0x78] sm:$0xff] (!%p138_p2)  ;;  %v187_v24 = vld [vmem:[%s5722_s0 + $0x60] sm:$0xff] (!%p138_p2) }
   0xa   : > { %4683 = vset.pattern.permute.xlu0 (!%p138_p2), %v4706_v11  ;;  %4684 = vset.pattern.permute.xlu1 (!%p138_p2), %v4706_v11  ;;  %v189_v25 = vld [vmem:[%s5722_s0 + $0x70] sm:$0xff] (!%p138_p2) }
   0xd   : > { %s5727_s13 = smov (!%p161_p3, %s4227_s13), 1 }
   0xe   : > { %s4410_s26 = sshll.u32 %s5727_s13, 5  ;;  %s4411_s7 = sshll.u32 %s5727_s13, 6 }
   0xf   : > { %s4765_s29 = scalar_lea.vmem %s5724_s2, %s4410_s26  ;;  %s5697_s10 = scalar_lea.vmem %s5725_s3, %s4411_s7 }
  0x10   : > { %v4768_v7 = vld [vmem:[%s4765_s29] sm:$0xff]  ;;  %v4771_v8 = vld [vmem:[%s4765_s29 + $0x10] sm:$0xff]  ;;  %v4776_v9 = vld [vmem:[%s4765_s29 + $0x8] sm:$0xff] }
  0x11   : > { %211 = vrot.lane.b32.xlu0 %v4768_v7, %s4705_s30  ;;  %215 = vrot.lane.b32.xlu1 %v4771_v8, %s4705_s30  ;;  %v4779_v10 = vld [vmem:[%s4765_s29 + $0x18] sm:$0xff] }
  0x15   : > { %213 = vrot.lane.b32.xlu0 %v4776_v9, %s4705_s30  ;;  %217 = vrot.lane.b32.xlu1 %v4779_v10, %s4705_s30 }
  0x19   : > { %193 = vperm.xlu0 %4683, %v4768_v7   ;;  %198 = vperm.xlu1 %4684, %v4776_v9  }
  0x1d   : > { %203 = vperm.xlu1 %4684, %v4771_v8   ;;  %208 = vperm.xlu0 %4683, %v4779_v10  }
  0x21   : > { %4685 = vset.pattern.permute.xlu1 %v4707_v26  ;;  %4686 = vset.pattern.permute.xlu0 %v4707_v26 }
  0x22   : > { %1009 = vperm.xlu1 %4685, %v4768_v7   ;;  %1013 = vperm.xlu0 %4686, %v4776_v9  }
  0x26   : > { %1017 = vperm.xlu1 %4685, %v4771_v8  }
  0x2a   : > { %1021 = vperm.xlu1 %4685, %v4779_v10  }
  0x83   : > { %v4787_v12 = vpop.permute.xlu0 %211  ;;  %v4809_v18 = vpop.permute.xlu1 %215 }
  0x84   : > { %4236 = vmatmul.mubr.msk.f32.vlgmr.msra.gmra.mrb[0].mxu0 %vm219_vm0, %v4787_v12  ;;  %4240 = vmatmul.mubr.msk.f32.vlgmr.msra.gmra.mrb[0].mxu1 %vm219_vm0, %v4787_v12 }
  0x85   : > { %298 = vmatprep.mubr.f32.mxu0 %v4704_v6  ;;  %387 = vmatprep.mubr.f32.mxu1 %v4704_v6 }
  0x86   : > { %407 = vmatpush1.msra.mxu0 %v179_v13  ;;  %496 = vmatpush1.msra.mxu1 %v181_v14 }
  0x87   : > { %v4807_v17 = vpop.permute.xlu0 %213  ;;  %584 = vmatprep.subr.mxu0 %v184_v15  ;;  %673 = vmatprep.subr.mxu1 %v186_v16  ;;  %v4821_v19 = vpop.permute.xlu1 %217 }
  0x88   : > { %4237 = vmatmul.mubr.msk.f32.gmra.mrb[2].mxu0 %vm219_vm0, %v4807_v17  ;;  %4241 = vmatmul.mubr.msk.f32.gmra.mrb[2].mxu1 %vm219_vm0, %v4807_v17 }
  0x89   : > { %304 = vmatprep.mubr.f32.mxu0 %v4704_v6  ;;  %393 = vmatprep.mubr.f32.mxu1 %v4704_v6 }
  0x8c   : > { %4238 = vmatmul.mubr.msk.f32.gmra.mrb[4].mxu0 %vm219_vm0, %v4809_v18  ;;  %4242 = vmatmul.mubr.msk.f32.gmra.mrb[4].mxu1 %vm219_vm0, %v4809_v18 }
  0x8d   : > { %310 = vmatprep.mubr.f32.mxu0 %v4704_v6  ;;  %399 = vmatprep.mubr.f32.mxu1 %v4704_v6 }
  0x90   : > { %4239 = vmatmul.mubr.msk.f32.gmra.mrb[6].mxu0 %vm219_vm0, %v4821_v19  ;;  %4243 = vmatmul.mubr.msk.f32.gmra.mrb[6].mxu1 %vm219_vm0, %v4821_v19 }
  0x91   : > { %470 = vmatprep.mubr.f32.mxu0 %v4704_v6  ;;  %559 = vmatprep.mubr.f32.mxu1 %v4704_v6 }
  0x94   : > { %4244 = vmatmul.mubr.msk.f32.vlgmr.msra.gmra.mrb[8].mxu0 %vm219_vm0, %v4787_v12  ;;  %4248 = vmatmul.mubr.msk.f32.vlgmr.msra.gmra.mrb[8].mxu1 %vm219_vm0, %v4787_v12 }
  0x95   : > { %476 = vmatprep.mubr.f32.mxu0 %v4704_v6  ;;  %565 = vmatprep.mubr.f32.mxu1 %v4704_v6 }
  0x96   : > { %585 = vmatpush1.msra.mxu0 %v183_v20  ;;  %674 = vmatpush1.msra.mxu1 %v185_v21 }
  0x97   : > { %762 = vmatprep.subr.mxu0 %v188_v22  ;;  %851 = vmatprep.subr.mxu1 %v190_v23 }
  0x98   : > { %4245 = vmatmul.mubr.msk.f32.gmra.mrb[10].mxu0 %vm219_vm0, %v4807_v17  ;;  %4249 = vmatmul.mubr.msk.f32.gmra.mrb[10].mxu1 %vm219_vm0, %v4807_v17  ;;  %v4925_v27 = vpop.permute.xlu0 %193  ;;  %v4927_v28 = vpop.permute.xlu1 %198 }
  0x99   : > { %482 = vmatprep.mubr.f32.mxu0 %v4704_v6  ;;  %571 = vmatprep.mubr.f32.mxu1 %v4704_v6 }
  0x9c   : > { %4246 = vmatmul.mubr.msk.f32.gmra.mrb[12].mxu0 %vm219_vm0, %v4809_v18  ;;  %4250 = vmatmul.mubr.msk.f32.gmra.mrb[12].mxu1 %vm219_vm0, %v4809_v18  ;;  %v4937_v49 = vpop.permute.xlu1 %203  ;;  %v4939_v62 = vpop.permute.xlu0 %208 }
  0x9d   : > { %488 = vmatprep.mubr.f32.mxu0 %v4704_v6  ;;  %577 = vmatprep.mubr.f32.mxu1 %v4704_v6 }
  0xa0   : > { %4247 = vmatmul.mubr.msk.f32.gmra.mrb[14].mxu0 %vm219_vm0, %v4821_v19  ;;  %4251 = vmatmul.mubr.msk.f32.gmra.mrb[14].mxu1 %vm219_vm0, %v4821_v19 }
  0xa1   : > { %648 = vmatprep.mubr.f32.mxu0 %v4704_v6  ;;  %737 = vmatprep.mubr.f32.mxu1 %v4704_v6 }
  0xa4   : > { %4252 = vmatmul.mubr.msk.f32.vlgmr.msra.gmra.mrb[16].mxu0 %vm219_vm0, %v4787_v12  ;;  %4256 = vmatmul.mubr.msk.f32.vlgmr.msra.gmra.mrb[16].mxu1 %vm219_vm0, %v4787_v12 }
  0xa5   : > { %654 = vmatprep.mubr.f32.mxu0 %v4704_v6  ;;  %743 = vmatprep.mubr.f32.mxu1 %v4704_v6 }
  0xa6   : > { %763 = vmatpush1.msra.mxu0 %v187_v24  ;;  %852 = vmatpush1.msra.mxu1 %v189_v25 }
  0xa8   : > { %4253 = vmatmul.mubr.msk.f32.gmra.mrb[18].mxu0 %vm219_vm0, %v4807_v17  ;;  %4257 = vmatmul.mubr.msk.f32.gmra.mrb[18].mxu1 %vm219_vm0, %v4807_v17 }
  0xa9   : > { %660 = vmatprep.mubr.f32.mxu0 %v4704_v6  ;;  %749 = vmatprep.mubr.f32.mxu1 %v4704_v6 }
  0xac   : > { %4254 = vmatmul.mubr.msk.f32.gmra.mrb[20].mxu0 %vm219_vm0, %v4809_v18  ;;  %4258 = vmatmul.mubr.msk.f32.gmra.mrb[20].mxu1 %vm219_vm0, %v4809_v18 }
  0xad   : > { %666 = vmatprep.mubr.f32.mxu0 %v4704_v6  ;;  %755 = vmatprep.mubr.f32.mxu1 %v4704_v6 }
  0xb0   : > { %4255 = vmatmul.mubr.msk.f32.gmra.mrb[22].mxu0 %vm219_vm0, %v4821_v19  ;;  %4259 = vmatmul.mubr.msk.f32.gmra.mrb[22].mxu1 %vm219_vm0, %v4821_v19 }
  0xb1   : > { %826 = vmatprep.mubr.f32.mxu0 %v4704_v6  ;;  %915 = vmatprep.mubr.f32.mxu1 %v4704_v6 }
  0xb4   : > { %4260 = vmatmul.mubr.msk.f32.vlgmr.msra.gmra.mrb[24].mxu0 %vm219_vm0, %v4787_v12  ;;  %4264 = vmatmul.mubr.msk.f32.vlgmr.msra.gmra.mrb[24].mxu1 %vm219_vm0, %v4787_v12 }
  0xb5   : > { %832 = vmatprep.mubr.f32.mxu0 %v4704_v6  ;;  %921 = vmatprep.mubr.f32.mxu1 %v4704_v6 }
  0xb8   : > { %4261 = vmatmul.mubr.msk.f32.gmra.mrb[26].mxu0 %vm219_vm0, %v4807_v17  ;;  %4265 = vmatmul.mubr.msk.f32.gmra.mrb[26].mxu1 %vm219_vm0, %v4807_v17 }
  0xb9   : > { %838 = vmatprep.mubr.f32.mxu0 %v4704_v6  ;;  %927 = vmatprep.mubr.f32.mxu1 %v4704_v6 }
  0xbc   : > { %4262 = vmatmul.mubr.msk.f32.gmra.mrb[28].mxu0 %vm219_vm0, %v4809_v18  ;;  %4266 = vmatmul.mubr.msk.f32.gmra.mrb[28].mxu1 %vm219_vm0, %v4809_v18 }
  0xbd   : > { %844 = vmatprep.mubr.f32.mxu0 %v4704_v6  ;;  %933 = vmatprep.mubr.f32.mxu1 %v4704_v6 }
  0xc0   : > { %4263 = vmatmul.mubr.msk.f32.gmra.mrb[30].mxu0 %vm219_vm0, %v4821_v19  ;;  %4267 = vmatmul.mubr.msk.f32.gmra.mrb[30].mxu1 %vm219_vm0, %v4821_v19 }
  0xc1   : > { %1101 = vmatprep.mubr.f32.mxu0 %v4704_v6  ;;  %1190 = vmatprep.mubr.f32.mxu1 %v4704_v6 }
 0x157   : > { %v294_v29 = vpop.f32.mrb[0].mxu0  ;;  %v383_v30 = vpop.f32.mrb[0].mxu1 }
 0x158   : > { %v296_v31 = vpop.f32.mrb[1].mxu0  ;;  %v385_v32 = vpop.f32.mrb[1].mxu1  ;;  %v295_v33 = vadd.f32 %v294_v29, %v4925_v27  ;;  %v384_v34 = vadd.f32 %v383_v30, %v4925_v27 }
 0x159   : > { %v297_v35 = vadd.f32 %v296_v31, %v4925_v27  ;;  %v386_v36 = vadd.f32 %v385_v32, %v4925_v27 }
 0x15a   : > { %v940_v45 = vmax.f32 %v295_v33, 0.0  ;;  %v942_v47 = vmax.f32 %v384_v34, 0.0 }
 0x15b   : > { %v300_v37 = vpop.f32.mrb[2].mxu0  ;;  %v389_v38 = vpop.f32.mrb[2].mxu1  ;;  %v941_v50 = vmax.f32 %v297_v35, 0.0  ;;  %v943_v51 = vmax.f32 %v386_v36, 0.0 }
 0x15c   : > { %v301_v39 = vadd.f32 %v300_v37, %v4927_v28  ;;  %v390_v40 = vadd.f32 %v389_v38, %v4927_v28  ;;  %v302_v41 = vpop.f32.mrb[3].mxu0  ;;  %v391_v42 = vpop.f32.mrb[3].mxu1 }
 0x15d   : > { %v303_v43 = vadd.f32 %v302_v41, %v4927_v28  ;;  %v392_v44 = vadd.f32 %v391_v42, %v4927_v28 }
 0x15e   : > { %v956_v46 = vmax.f32 %v301_v39, 0.0  ;;  %v958_v48 = vmax.f32 %v390_v40, 0.0 }
 0x15f   : > { %v957_v52 = vmax.f32 %v303_v43, 0.0  ;;  %v959_v53 = vmax.f32 %v392_v44, 0.0  ;;  %v306_v54 = vpop.f32.mrb[4].mxu0  ;;  %v395_v55 = vpop.f32.mrb[4].mxu1  ;;  %v4958_v44 = vld [vmem:[%s5723_s1] sm:$0xff] }
 0x160   : > { %v4414_v56 = vpack.c.bf16 %v956_v46, %v940_v45  ;;  %v4422_v57 = vpack.c.bf16 %v958_v48, %v942_v47  ;;  %v308_v58 = vpop.f32.mrb[5].mxu0  ;;  %v397_v59 = vpop.f32.mrb[5].mxu1  ;;  %v307_v63 = vadd.f32 %v306_v54, %v4937_v49  ;;  %v396_v0 = vadd.f32 %v395_v55, %v4937_v49 }
 0x161   : > { %v4412_v60 = vpack.c.bf16 %v957_v52, %v941_v50  ;;  %v4420_v61 = vpack.c.bf16 %v959_v53, %v943_v51  ;;  %v309_v1 = vadd.f32 %v308_v58, %v4937_v49  ;;  %v398_v2 = vadd.f32 %v397_v59, %v4937_v49 }
 0x162   : > { %v972_v16 = vmax.f32 %v307_v63, 0.0  ;;  %v974_v17 = vmax.f32 %v396_v0, 0.0  ;;  %v4970_v63 = vld [vmem:[%s5723_s1 + $0x8] sm:$0xff] }
 0x163   : > { %v312_v3 = vpop.f32.mrb[6].mxu0  ;;  %v401_v4 = vpop.f32.mrb[6].mxu1  ;;  %4413 = vmatprep.subr.bf16.mxu0 %v4412_v60  ;;  %4421 = vmatprep.subr.bf16.mxu1 %v4420_v61  ;;  %v973_v20 = vmax.f32 %v309_v1, 0.0  ;;  %v975_v21 = vmax.f32 %v398_v2, 0.0 }
 0x164   : > { %v313_v5 = vadd.f32 %v312_v3, %v4939_v62  ;;  %v402_v11 = vadd.f32 %v401_v4, %v4939_v62  ;;  %v314_v12 = vpop.f32.mrb[7].mxu0  ;;  %v403_v13 = vpop.f32.mrb[7].mxu1  ;;  %4415 = vmatpush1.bf16.msra.mxu0 %v4414_v56  ;;  %4423 = vmatpush1.bf16.msra.mxu1 %v4422_v57 }
 0x165   : > { %v315_v14 = vadd.f32 %v314_v12, %v4939_v62  ;;  %v404_v15 = vadd.f32 %v403_v13, %v4939_v62 }
 0x166   : > { %v988_v18 = vmax.f32 %v313_v5, 0.0  ;;  %v990_v19 = vmax.f32 %v402_v11, 0.0 }
 0x167   : > { %v989_v22 = vmax.f32 %v315_v14, 0.0  ;;  %v991_v23 = vmax.f32 %v404_v15, 0.0  ;;  %v472_v24 = vpop.f32.mrb[8].mxu0  ;;  %v561_v25 = vpop.f32.mrb[8].mxu1 }
 0x168   : > { %v4418_v26 = vpack.c.bf16 %v988_v18, %v972_v16  ;;  %v4426_v29 = vpack.c.bf16 %v990_v19, %v974_v17  ;;  %v474_v30 = vpop.f32.mrb[9].mxu0  ;;  %v563_v31 = vpop.f32.mrb[9].mxu1  ;;  %v473_v34 = vadd.f32 %v472_v24, %v4925_v27  ;;  %v562_v35 = vadd.f32 %v561_v25, %v4925_v27  ;;  %v4986_v17 = vld [vmem:[%s5723_s1 + $0x10] sm:$0xff] }
 0x169   : > { %v4416_v32 = vpack.c.bf16 %v989_v22, %v973_v20  ;;  %v4424_v33 = vpack.c.bf16 %v991_v23, %v975_v21  ;;  %v475_v36 = vadd.f32 %v474_v30, %v4925_v27  ;;  %v564_v37 = vadd.f32 %v563_v31, %v4925_v27 }
 0x16a   : > { %v944_v47 = vmax.f32 %v473_v34, 0.0  ;;  %v946_v48 = vmax.f32 %v562_v35, 0.0 }
 0x16b   : > { %v478_v38 = vpop.f32.mrb[10].mxu0  ;;  %v567_v39 = vpop.f32.mrb[10].mxu1  ;;  %4417 = vmatprep.subr.bf16.mxu0 %v4416_v32  ;;  %4425 = vmatprep.subr.bf16.mxu1 %v4424_v33  ;;  %v945_v52 = vmax.f32 %v475_v36, 0.0  ;;  %v947_v53 = vmax.f32 %v564_v37, 0.0  ;;  %v5000_v36 = vld [vmem:[%s5723_s1 + $0x18] sm:$0xff] }
 0x16c   : > { %v479_v40 = vadd.f32 %v478_v38, %v4927_v28  ;;  %v568_v41 = vadd.f32 %v567_v39, %v4927_v28  ;;  %v480_v42 = vpop.f32.mrb[11].mxu0  ;;  %v569_v43 = vpop.f32.mrb[11].mxu1  ;;  %4419 = vmatpush1.bf16.msra.mxu0 %v4418_v26  ;;  %4427 = vmatpush1.bf16.msra.mxu1 %v4426_v29 }
 0x16d   : > { %v481_v45 = vadd.f32 %v480_v42, %v4927_v28  ;;  %v570_v46 = vadd.f32 %v569_v43, %v4927_v28 }
 0x16e   : > { %v960_v50 = vmax.f32 %v479_v40, 0.0  ;;  %v962_v51 = vmax.f32 %v568_v41, 0.0 }
 0x16f   : > { %v961_v54 = vmax.f32 %v481_v45, 0.0  ;;  %v963_v55 = vmax.f32 %v570_v46, 0.0  ;;  %v484_v56 = vpop.f32.mrb[12].mxu0  ;;  %v573_v57 = vpop.f32.mrb[12].mxu1  ;;  %4268 = vmatmul.mubr.msk.f32.vlgmr.msra.gmra.mrb[32].mxu0 %vm1024_vm1, %v4958_v44  ;;  %4272 = vmatmul.mubr.msk.f32.vlgmr.msra.gmra.mrb[32].mxu1 %vm1024_vm1, %v4958_v44 }
 0x170   : > { %v4430_v58 = vpack.c.bf16 %v960_v50, %v944_v47  ;;  %v4438_v59 = vpack.c.bf16 %v962_v51, %v946_v48  ;;  %v486_v60 = vpop.f32.mrb[13].mxu0  ;;  %v575_v61 = vpop.f32.mrb[13].mxu1  ;;  %1107 = vmatprep.mubr.f32.mxu0 %v4704_v6  ;;  %1196 = vmatprep.mubr.f32.mxu1 %v4704_v6  ;;  %v485_v2 = vadd.f32 %v484_v56, %v4937_v49 }
 0x171   : > { %v4428_v0 = vpack.c.bf16 %v961_v54, %v945_v52  ;;  %v4436_v1 = vpack.c.bf16 %v963_v55, %v947_v53  ;;  %v574_v3 = vadd.f32 %v573_v57, %v4937_v49  ;;  %v487_v4 = vadd.f32 %v486_v60, %v4937_v49 }
 0x172   : > { %v576_v5 = vadd.f32 %v575_v61, %v4937_v49  ;;  %v976_v20 = vmax.f32 %v485_v2, 0.0 }
 0x173   : > { %v490_v11 = vpop.f32.mrb[14].mxu0  ;;  %v579_v12 = vpop.f32.mrb[14].mxu1  ;;  %4269 = vmatmul.mubr.msk.f32.gmra.mrb[34].mxu0 %vm1024_vm1, %v4970_v63  ;;  %4273 = vmatmul.mubr.msk.f32.gmra.mrb[34].mxu1 %vm1024_vm1, %v4970_v63  ;;  %v978_v21 = vmax.f32 %v574_v3, 0.0  ;;  %v977_v24 = vmax.f32 %v487_v4, 0.0 }
 0x174   : > { %v491_v13 = vadd.f32 %v490_v11, %v4939_v62  ;;  %v580_v14 = vadd.f32 %v579_v12, %v4939_v62  ;;  %4429 = vmatprep.subr.bf16.mxu0 %v4428_v0  ;;  %4437 = vmatprep.subr.bf16.mxu1 %v4436_v1  ;;  %v492_v15 = vpop.f32.mrb[15].mxu0  ;;  %v581_v16 = vpop.f32.mrb[15].mxu1  ;;  %v979_v25 = vmax.f32 %v576_v5, 0.0 }
 0x175   : > { %v493_v18 = vadd.f32 %v492_v15, %v4939_v62  ;;  %v582_v19 = vadd.f32 %v581_v16, %v4939_v62  ;;  %4431 = vmatpush1.bf16.msra.mxu0 %v4430_v58  ;;  %4439 = vmatpush1.bf16.msra.mxu1 %v4438_v59 }
 0x176   : > { %v992_v22 = vmax.f32 %v491_v13, 0.0  ;;  %v994_v23 = vmax.f32 %v580_v14, 0.0  ;;  %1113 = vmatprep.mubr.f32.mxu0 %v4704_v6  ;;  %1202 = vmatprep.mubr.f32.mxu1 %v4704_v6 }
 0x177   : > { %v993_v26 = vmax.f32 %v493_v18, 0.0  ;;  %v995_v29 = vmax.f32 %v582_v19, 0.0  ;;  %v650_v30 = vpop.f32.mrb[16].mxu0  ;;  %v739_v31 = vpop.f32.mrb[16].mxu1  ;;  %4270 = vmatmul.mubr.msk.f32.gmra.mrb[36].mxu0 %vm1024_vm1, %v4986_v17  ;;  %4274 = vmatmul.mubr.msk.f32.gmra.mrb[36].mxu1 %vm1024_vm1, %v4986_v17 }
 0x178   : > { %v4434_v32 = vpack.c.bf16 %v992_v22, %v976_v20  ;;  %v4442_v33 = vpack.c.bf16 %v994_v23, %v978_v21  ;;  %v652_v34 = vpop.f32.mrb[17].mxu0  ;;  %v741_v35 = vpop.f32.mrb[17].mxu1  ;;  %1119 = vmatprep.mubr.f32.mxu0 %v4704_v6  ;;  %1208 = vmatprep.mubr.f32.mxu1 %v4704_v6  ;;  %v651_v39 = vadd.f32 %v650_v30, %v4925_v27 }
 0x179   : > { %v4432_v37 = vpack.c.bf16 %v993_v26, %v977_v24  ;;  %v4440_v38 = vpack.c.bf16 %v995_v29, %v979_v25  ;;  %v740_v40 = vadd.f32 %v739_v31, %v4925_v27  ;;  %v653_v41 = vadd.f32 %v652_v34, %v4925_v27 }
 0x17a   : > { %v742_v42 = vadd.f32 %v741_v35, %v4925_v27  ;;  %v948_v53 = vmax.f32 %v651_v39, 0.0 }
 0x17b   : > { %v656_v43 = vpop.f32.mrb[18].mxu0  ;;  %v745_v45 = vpop.f32.mrb[18].mxu1  ;;  %4271 = vmatmul.mubr.msk.f32.gmra.mrb[38].mxu0 %vm1024_vm1, %v5000_v36  ;;  %4275 = vmatmul.mubr.msk.f32.gmra.mrb[38].mxu1 %vm1024_vm1, %v5000_v36  ;;  %v950_v54 = vmax.f32 %v740_v40, 0.0  ;;  %v949_v57 = vmax.f32 %v653_v41, 0.0 }
 0x17c   : > { %v657_v46 = vadd.f32 %v656_v43, %v4927_v28  ;;  %v746_v47 = vadd.f32 %v745_v45, %v4927_v28  ;;  %4433 = vmatprep.subr.bf16.mxu0 %v4432_v37  ;;  %4441 = vmatprep.subr.bf16.mxu1 %v4440_v38  ;;  %v658_v48 = vpop.f32.mrb[19].mxu0  ;;  %v747_v50 = vpop.f32.mrb[19].mxu1  ;;  %v951_v58 = vmax.f32 %v742_v42, 0.0 }
 0x17d   : > { %v659_v51 = vadd.f32 %v658_v48, %v4927_v28  ;;  %v748_v52 = vadd.f32 %v747_v50, %v4927_v28  ;;  %4435 = vmatpush1.bf16.msra.mxu0 %v4434_v32  ;;  %4443 = vmatpush1.bf16.msra.mxu1 %v4442_v33 }
 0x17e   : > { %v964_v55 = vmax.f32 %v657_v46, 0.0  ;;  %v966_v56 = vmax.f32 %v746_v47, 0.0  ;;  %1279 = vmatprep.mubr.f32.mxu0 %v4704_v6  ;;  %1368 = vmatprep.mubr.f32.mxu1 %v4704_v6 }
 0x17f   : > { %v965_v59 = vmax.f32 %v659_v51, 0.0  ;;  %v967_v60 = vmax.f32 %v748_v52, 0.0  ;;  %v662_v61 = vpop.f32.mrb[20].mxu0  ;;  %v751_v0 = vpop.f32.mrb[20].mxu1 }
 0x180   : > { %v4446_v1 = vpack.c.bf16 %v964_v55, %v948_v53  ;;  %v4454_v2 = vpack.c.bf16 %v966_v56, %v950_v54  ;;  %4276 = vmatmul.mubr.msk.f32.vlgmr.msra.gmra.mrb[40].mxu0 %vm1024_vm1, %v4958_v44  ;;  %v664_v3 = vpop.f32.mrb[21].mxu0  ;;  %v753_v4 = vpop.f32.mrb[21].mxu1  ;;  %4280 = vmatmul.mubr.msk.f32.vlgmr.msra.gmra.mrb[40].mxu1 %vm1024_vm1, %v4958_v44  ;;  %v663_v12 = vadd.f32 %v662_v61, %v4937_v49 }
 0x181   : > { %v4444_v5 = vpack.c.bf16 %v965_v59, %v949_v57  ;;  %v4452_v11 = vpack.c.bf16 %v967_v60, %v951_v58  ;;  %v752_v13 = vadd.f32 %v751_v0, %v4937_v49  ;;  %1285 = vmatprep.mubr.f32.mxu0 %v4704_v6  ;;  %1374 = vmatprep.mubr.f32.mxu1 %v4704_v6 }
 0x182   : > { %v665_v14 = vadd.f32 %v664_v3, %v4937_v49  ;;  %v754_v15 = vadd.f32 %v753_v4, %v4937_v49  ;;  %v980_v25 = vmax.f32 %v663_v12, 0.0 }
 0x183   : > { %v668_v16 = vpop.f32.mrb[22].mxu0  ;;  %v757_v18 = vpop.f32.mrb[22].mxu1  ;;  %4445 = vmatprep.subr.bf16.mxu0 %v4444_v5  ;;  %4453 = vmatprep.subr.bf16.mxu1 %v4452_v11  ;;  %v982_v26 = vmax.f32 %v752_v13, 0.0 }
 0x184   : > { %v669_v19 = vadd.f32 %v668_v16, %v4939_v62  ;;  %v758_v20 = vadd.f32 %v757_v18, %v4939_v62  ;;  %4277 = vmatmul.mubr.msk.f32.gmra.mrb[42].mxu0 %vm1024_vm1, %v4970_v63  ;;  %v670_v21 = vpop.f32.mrb[23].mxu0  ;;  %v759_v22 = vpop.f32.mrb[23].mxu1  ;;  %4455 = vmatpush1.bf16.msra.mxu1 %v4454_v2  ;;  %v981_v31 = vmax.f32 %v665_v14, 0.0  ;;  %v983_v32 = vmax.f32 %v754_v15, 0.0 }
 0x185   : > { %4281 = vmatmul.mubr.msk.f32.gmra.mrb[42].mxu1 %vm1024_vm1, %v4970_v63  ;;  %v671_v23 = vadd.f32 %v670_v21, %v4939_v62  ;;  %v760_v24 = vadd.f32 %v759_v22, %v4939_v62  ;;  %4447 = vmatpush1.bf16.msra.mxu0 %v4446_v1 }
 0x186   : > { %v996_v29 = vmax.f32 %v669_v19, 0.0  ;;  %v998_v30 = vmax.f32 %v758_v20, 0.0  ;;  %1291 = vmatprep.mubr.f32.mxu0 %v4704_v6  ;;  %1380 = vmatprep.mubr.f32.mxu1 %v4704_v6 }
 0x187   : > { %v997_v33 = vmax.f32 %v671_v23, 0.0  ;;  %v999_v34 = vmax.f32 %v760_v24, 0.0  ;;  %v828_v35 = vpop.f32.mrb[24].mxu0  ;;  %v917_v37 = vpop.f32.mrb[24].mxu1 }
 0x188   : > { %v4450_v38 = vpack.c.bf16 %v996_v29, %v980_v25  ;;  %v4458_v39 = vpack.c.bf16 %v998_v30, %v982_v26  ;;  %4278 = vmatmul.mubr.msk.f32.gmra.mrb[44].mxu0 %vm1024_vm1, %v4986_v17  ;;  %v830_v40 = vpop.f32.mrb[25].mxu0  ;;  %v919_v41 = vpop.f32.mrb[25].mxu1  ;;  %v829_v45 = vadd.f32 %v828_v35, %v4925_v27  ;;  %v918_v46 = vadd.f32 %v917_v37, %v4925_v27 }
 0x189   : > { %v4448_v42 = vpack.c.bf16 %v997_v33, %v981_v31  ;;  %v4456_v43 = vpack.c.bf16 %v999_v34, %v983_v32  ;;  %4282 = vmatmul.mubr.msk.f32.gmra.mrb[44].mxu1 %vm1024_vm1, %v4986_v17  ;;  %1297 = vmatprep.mubr.f32.mxu0 %v4704_v6  ;;  %v831_v47 = vadd.f32 %v830_v40, %v4925_v27 }
 0x18a   : > { %1386 = vmatprep.mubr.f32.mxu1 %v4704_v6  ;;  %v920_v48 = vadd.f32 %v919_v41, %v4925_v27  ;;  %v952_v57 = vmax.f32 %v829_v45, 0.0  ;;  %v954_v58 = vmax.f32 %v918_v46, 0.0 }
 0x18b   : > { %v834_v50 = vpop.f32.mrb[26].mxu0  ;;  %v923_v51 = vpop.f32.mrb[26].mxu1  ;;  %4449 = vmatprep.subr.bf16.mxu0 %v4448_v42  ;;  %4457 = vmatprep.subr.bf16.mxu1 %v4456_v43  ;;  %v953_v61 = vmax.f32 %v831_v47, 0.0 }
 0x18c   : > { %v835_v52 = vadd.f32 %v834_v50, %v4927_v28  ;;  %v924_v53 = vadd.f32 %v923_v51, %v4927_v28  ;;  %4279 = vmatmul.mubr.msk.f32.gmra.mrb[46].mxu0 %vm1024_vm1, %v5000_v36  ;;  %v836_v54 = vpop.f32.mrb[27].mxu0  ;;  %v925_v55 = vpop.f32.mrb[27].mxu1  ;;  %4459 = vmatpush1.bf16.msra.mxu1 %v4458_v39  ;;  %v955_v0 = vmax.f32 %v920_v48, 0.0 }
 0x18d   : > { %4283 = vmatmul.mubr.msk.f32.gmra.mrb[46].mxu1 %vm1024_vm1, %v5000_v36  ;;  %v837_v56 = vadd.f32 %v836_v54, %v4927_v28  ;;  %v926_v27 = vadd.f32 %v925_v55, %v4927_v28  ;;  %4451 = vmatpush1.bf16.msra.mxu0 %v4450_v38  ;;  %v5119_v43 = vpop.permute.xlu0 %1013 }
 0x18e   : > { %v968_v59 = vmax.f32 %v835_v52, 0.0  ;;  %v970_v60 = vmax.f32 %v924_v53, 0.0  ;;  %1457 = vmatprep.mubr.f32.mxu0 %v4704_v6  ;;  %1546 = vmatprep.mubr.f32.mxu1 %v4704_v6 }
 0x18f   : > { %v969_v1 = vmax.f32 %v837_v56, 0.0  ;;  %v971_v2 = vmax.f32 %v926_v27, 0.0  ;;  %v840_v3 = vpop.f32.mrb[28].mxu0  ;;  %v929_v4 = vpop.f32.mrb[28].mxu1 }
 0x190   : > { %v4462_v5 = vpack.c.bf16 %v968_v59, %v952_v57  ;;  %v4470_v11 = vpack.c.bf16 %v970_v60, %v954_v58  ;;  %4284 = vmatmul.mubr.msk.f32.vlgmr.msra.gmra.mrb[48].mxu0 %vm1024_vm1, %v4958_v44  ;;  %v842_v28 = vpop.f32.mrb[29].mxu0  ;;  %v931_v12 = vpop.f32.mrb[29].mxu1  ;;  %v841_v15 = vadd.f32 %v840_v3, %v4937_v49  ;;  %v930_v16 = vadd.f32 %v929_v4, %v4937_v49 }
 0x191   : > { %v4460_v13 = vpack.c.bf16 %v969_v1, %v953_v61  ;;  %v4468_v14 = vpack.c.bf16 %v971_v2, %v955_v0  ;;  %4288 = vmatmul.mubr.msk.f32.vlgmr.msra.gmra.mrb[48].mxu1 %vm1024_vm1, %v4958_v44  ;;  %1463 = vmatprep.mubr.f32.mxu0 %v4704_v6  ;;  %v843_v18 = vadd.f32 %v842_v28, %v4937_v49 }
 0x192   : > { %1552 = vmatprep.mubr.f32.mxu1 %v4704_v6  ;;  %v932_v19 = vadd.f32 %v931_v12, %v4937_v49  ;;  %v984_v29 = vmax.f32 %v841_v15, 0.0  ;;  %v986_v30 = vmax.f32 %v930_v16, 0.0 }
 0x193   : > { %v846_v20 = vpop.f32.mrb[30].mxu0  ;;  %v935_v21 = vpop.f32.mrb[30].mxu1  ;;  %4461 = vmatprep.subr.bf16.mxu0 %v4460_v13  ;;  %4469 = vmatprep.subr.bf16.mxu1 %v4468_v14  ;;  %v985_v33 = vmax.f32 %v843_v18, 0.0 }
 0x194   : > { %v847_v22 = vadd.f32 %v846_v20, %v4939_v62  ;;  %v936_v23 = vadd.f32 %v935_v21, %v4939_v62  ;;  %4285 = vmatmul.mubr.msk.f32.gmra.mrb[50].mxu0 %vm1024_vm1, %v4970_v63  ;;  %v848_v24 = vpop.f32.mrb[31].mxu0  ;;  %v937_v25 = vpop.f32.mrb[31].mxu1  ;;  %4471 = vmatpush1.bf16.msra.mxu1 %v4470_v11  ;;  %v987_v34 = vmax.f32 %v932_v19, 0.0 }
 0x195   : > { %4289 = vmatmul.mubr.msk.f32.gmra.mrb[50].mxu1 %vm1024_vm1, %v4970_v63  ;;  %v849_v26 = vadd.f32 %v848_v24, %v4939_v62  ;;  %v938_v49 = vadd.f32 %v937_v25, %v4939_v62  ;;  %4463 = vmatpush1.bf16.msra.mxu0 %v4462_v5 }
 0x196   : > { %v1000_v31 = vmax.f32 %v847_v22, 0.0  ;;  %v1002_v32 = vmax.f32 %v936_v23, 0.0  ;;  %1469 = vmatprep.mubr.f32.mxu0 %v4704_v6  ;;  %1558 = vmatprep.mubr.f32.mxu1 %v4704_v6 }
 0x197   : > { %v1001_v35 = vmax.f32 %v849_v26, 0.0  ;;  %v1003_v37 = vmax.f32 %v938_v49, 0.0 }
 0x198   : > { %v4466_v38 = vpack.c.bf16 %v1000_v31, %v984_v29  ;;  %v4474_v39 = vpack.c.bf16 %v1002_v32, %v986_v30  ;;  %4286 = vmatmul.mubr.msk.f32.gmra.mrb[52].mxu0 %vm1024_vm1, %v4986_v17 }
 0x199   : > { %v4464_v40 = vpack.c.bf16 %v1001_v35, %v985_v33  ;;  %v4472_v62 = vpack.c.bf16 %v1003_v37, %v987_v34  ;;  %4290 = vmatmul.mubr.msk.f32.gmra.mrb[52].mxu1 %vm1024_vm1, %v4986_v17  ;;  %1475 = vmatprep.mubr.f32.mxu0 %v4704_v6 }
 0x19a   : > { %1564 = vmatprep.mubr.f32.mxu1 %v4704_v6 }
 0x19b   : > { %4465 = vmatprep.subr.bf16.mxu0 %v4464_v40  ;;  %4473 = vmatprep.subr.bf16.mxu1 %v4472_v62 }
 0x19c   : > { %4287 = vmatmul.mubr.msk.f32.gmra.mrb[54].mxu0 %vm1024_vm1, %v5000_v36  ;;  %4475 = vmatpush1.bf16.msra.mxu1 %v4474_v39 }
 0x19d   : > { %4291 = vmatmul.mubr.msk.f32.gmra.mrb[54].mxu1 %vm1024_vm1, %v5000_v36  ;;  %4467 = vmatpush1.bf16.msra.mxu0 %v4466_v38 }
 0x19e   : > { %1635 = vmatprep.mubr.f32.mxu0 %v4704_v6  ;;  %1724 = vmatprep.mubr.f32.mxu1 %v4704_v6 }
 0x1a0   : > { %4292 = vmatmul.mubr.msk.f32.vlgmr.msra.gmra.mrb[56].mxu0 %vm1024_vm1, %v4958_v44 }
 0x1a1   : > { %4296 = vmatmul.mubr.msk.f32.vlgmr.msra.gmra.mrb[56].mxu1 %vm1024_vm1, %v4958_v44  ;;  %1641 = vmatprep.mubr.f32.mxu0 %v4704_v6  ;;  %v4708_v44 = vmov 1  }
 0x1a2   : > { %1730 = vmatprep.mubr.f32.mxu1 %v4704_v6  ;;  %4687 = vset.pattern.permute.xlu0 %v4708_v44 }
 0x1a3   : > { %4688 = vset.pattern.permute.xlu1 %v4708_v44  ;;  %1819 = vperm.xlu0 %4687, %v4768_v7  }
 0x1a4   : > { %4293 = vmatmul.mubr.msk.f32.gmra.mrb[58].mxu0 %vm1024_vm1, %v4970_v63  ;;  %1823 = vperm.xlu1 %4688, %v4776_v9  }
 0x1a5   : > { %4297 = vmatmul.mubr.msk.f32.gmra.mrb[58].mxu1 %vm1024_vm1, %v4970_v63  ;;  %1647 = vmatprep.mubr.f32.mxu0 %v4704_v6  ;;  %v5117_v63 = vpop.permute.xlu1 %1009 }
 0x1a6   : > { %1736 = vmatprep.mubr.f32.mxu1 %v4704_v6 }
 0x1a7   : > { %1831 = vperm.xlu0 %4687, %v4779_v10  }
 0x1a8   : > { %4294 = vmatmul.mubr.msk.f32.gmra.mrb[60].mxu0 %vm1024_vm1, %v4986_v17  ;;  %1827 = vperm.xlu1 %4688, %v4771_v8  }
 0x1a9   : > { %4298 = vmatmul.mubr.msk.f32.gmra.mrb[60].mxu1 %vm1024_vm1, %v4986_v17  ;;  %1653 = vmatprep.mubr.f32.mxu0 %v4704_v6  ;;  %v5123_v47 = vpop.permute.xlu1 %1017 }
 0x1aa   : > { %1742 = vmatprep.mubr.f32.mxu1 %v4704_v6 }
 0x1ac   : > { %4295 = vmatmul.mubr.msk.f32.gmra.mrb[62].mxu0 %vm1024_vm1, %v5000_v36 }
 0x1ad   : > { %4299 = vmatmul.mubr.msk.f32.gmra.mrb[62].mxu1 %vm1024_vm1, %v5000_v36  ;;  %1910 = vmatprep.mubr.f32.mxu0 %v4704_v6  ;;  %v5131_v12 = vpop.permute.xlu1 %1021 }
 0x1ae   : > { %1999 = vmatprep.mubr.f32.mxu1 %v4704_v6 }
 0x242   : > { %v1103_v17 = vpop.f32.mrb[32].mxu0  ;;  %v1192_v41 = vpop.f32.mrb[32].mxu1 }
 0x243   : > { %v1105_v36 = vpop.f32.mrb[33].mxu0  ;;  %v1194_v42 = vpop.f32.mrb[33].mxu1  ;;  %v1104_v45 = vadd.f32 %v1103_v17, %v5117_v63  ;;  %v1193_v46 = vadd.f32 %v1192_v41, %v5117_v63 }
 0x244   : > { %v1106_v7 = vadd.f32 %v1105_v36, %v5117_v63  ;;  %v1195_v8 = vadd.f32 %v1194_v42, %v5117_v63 }
 0x245   : > { %v1749_v55 = vmax.f32 %v1104_v45, 0.0  ;;  %v1751_v56 = vmax.f32 %v1193_v46, 0.0  ;;  %v5147_v46 = vld [vmem:[%s5723_s1 + $0x20] sm:$0xff] }
 0x246   : > { %v1109_v9 = vpop.f32.mrb[34].mxu0  ;;  %v1198_v10 = vpop.f32.mrb[34].mxu1  ;;  %v1750_v58 = vmax.f32 %v1106_v7, 0.0  ;;  %v1752_v59 = vmax.f32 %v1195_v8, 0.0 }
 0x247   : > { %v1111_v48 = vpop.f32.mrb[35].mxu0  ;;  %v1200_v50 = vpop.f32.mrb[35].mxu1  ;;  %v1110_v51 = vadd.f32 %v1109_v9, %v5119_v43  ;;  %v1199_v52 = vadd.f32 %v1198_v10, %v5119_v43 }
 0x248   : > { %v1112_v53 = vadd.f32 %v1111_v48, %v5119_v43  ;;  %v1201_v54 = vadd.f32 %v1200_v50, %v5119_v43 }
 0x249   : > { %v1765_v27 = vmax.f32 %v1110_v51, 0.0  ;;  %v1767_v57 = vmax.f32 %v1199_v52, 0.0 }
 0x24a   : > { %v1766_v60 = vmax.f32 %v1112_v53, 0.0  ;;  %v1768_v61 = vmax.f32 %v1201_v54, 0.0  ;;  %v1115_v0 = vpop.f32.mrb[36].mxu0  ;;  %v1204_v1 = vpop.f32.mrb[36].mxu1 }
 0x24b   : > { %v1117_v2 = vpop.f32.mrb[37].mxu0  ;;  %v1206_v3 = vpop.f32.mrb[37].mxu1  ;;  %v4478_v4 = vpack.c.bf16 %v1765_v27, %v1749_v55  ;;  %v4486_v5 = vpack.c.bf16 %v1767_v57, %v1751_v56  ;;  %v1116_v13 = vadd.f32 %v1115_v0, %v5123_v47  ;;  %v1205_v14 = vadd.f32 %v1204_v1, %v5123_v47 }
 0x24c   : > { %v4476_v11 = vpack.c.bf16 %v1766_v60, %v1750_v58  ;;  %v4484_v28 = vpack.c.bf16 %v1768_v61, %v1752_v59  ;;  %v1118_v15 = vadd.f32 %v1117_v2, %v5123_v47  ;;  %v1207_v16 = vadd.f32 %v1206_v3, %v5123_v47  ;;  %v5163_v59 = vld [vmem:[%s5723_s1 + $0x28] sm:$0xff] }
 0x24d   : > { %v1781_v26 = vmax.f32 %v1116_v13, 0.0  ;;  %v1783_v49 = vmax.f32 %v1205_v14, 0.0 }
 0x24e   : > { %v1121_v18 = vpop.f32.mrb[38].mxu0  ;;  %v1210_v19 = vpop.f32.mrb[38].mxu1  ;;  %4477 = vmatprep.subr.bf16.mxu0 %v4476_v11  ;;  %4485 = vmatprep.subr.bf16.mxu1 %v4484_v28  ;;  %v1782_v31 = vmax.f32 %v1118_v15, 0.0  ;;  %v1784_v32 = vmax.f32 %v1207_v16, 0.0  ;;  %v5176_v16 = vld [vmem:[%s5723_s1 + $0x30] sm:$0xff] }
 0x24f   : > { %v1122_v20 = vadd.f32 %v1121_v18, %v5131_v12  ;;  %v1211_v21 = vadd.f32 %v1210_v19, %v5131_v12  ;;  %v1123_v22 = vpop.f32.mrb[39].mxu0  ;;  %v1212_v23 = vpop.f32.mrb[39].mxu1  ;;  %4479 = vmatpush1.bf16.msra.mxu0 %v4478_v4  ;;  %4487 = vmatpush1.bf16.msra.mxu1 %v4486_v5 }
 0x250   : > { %v1124_v24 = vadd.f32 %v1123_v22, %v5131_v12  ;;  %v1213_v25 = vadd.f32 %v1212_v23, %v5131_v12 }
 0x251   : > { %v1797_v29 = vmax.f32 %v1122_v20, 0.0  ;;  %v1799_v30 = vmax.f32 %v1211_v21, 0.0 }
 0x252   : > { %v1798_v33 = vmax.f32 %v1124_v24, 0.0  ;;  %v1800_v34 = vmax.f32 %v1213_v25, 0.0 }
 0x253   : > { %v4482_v35 = vpack.c.bf16 %v1797_v29, %v1781_v26  ;;  %v4490_v37 = vpack.c.bf16 %v1799_v30, %v1783_v49  ;;  %v1281_v38 = vpop.f32.mrb[40].mxu0  ;;  %v1370_v62 = vpop.f32.mrb[40].mxu1 }
 0x254   : > { %v4480_v39 = vpack.c.bf16 %v1798_v33, %v1782_v31  ;;  %v4488_v40 = vpack.c.bf16 %v1800_v34, %v1784_v32  ;;  %v1283_v44 = vpop.f32.mrb[41].mxu0  ;;  %v1372_v17 = vpop.f32.mrb[41].mxu1  ;;  %v1282_v41 = vadd.f32 %v1281_v38, %v5117_v63  ;;  %v1371_v36 = vadd.f32 %v1370_v62, %v5117_v63  ;;  %v5193_v34 = vld [vmem:[%s5723_s1 + $0x38] sm:$0xff] }
 0x255   : > { %v1284_v42 = vadd.f32 %v1283_v44, %v5117_v63  ;;  %v1373_v7 = vadd.f32 %v1372_v17, %v5117_v63 }
 0x256   : > { %4481 = vmatprep.subr.bf16.mxu0 %v4480_v39  ;;  %4489 = vmatprep.subr.bf16.mxu1 %v4488_v40  ;;  %v1753_v52 = vmax.f32 %v1282_v41, 0.0  ;;  %v1755_v55 = vmax.f32 %v1371_v36, 0.0 }
 0x257   : > { %v1287_v45 = vpop.f32.mrb[42].mxu0  ;;  %4483 = vmatpush1.bf16.msra.mxu0 %v4482_v35  ;;  %4491 = vmatpush1.bf16.msra.mxu1 %v4490_v37  ;;  %v1754_v56 = vmax.f32 %v1284_v42, 0.0  ;;  %v1756_v60 = vmax.f32 %v1373_v7, 0.0 }
 0x258   : > { %v1288_v8 = vadd.f32 %v1287_v45, %v5119_v43  ;;  %v1376_v9 = vpop.f32.mrb[42].mxu1  ;;  %v1289_v10 = vpop.f32.mrb[43].mxu0 }
 0x259   : > { %v1377_v48 = vadd.f32 %v1376_v9, %v5119_v43  ;;  %v1290_v50 = vadd.f32 %v1289_v10, %v5119_v43  ;;  %v1378_v51 = vpop.f32.mrb[43].mxu1 }
 0x25a   : > { %v1769_v53 = vmax.f32 %v1288_v8, 0.0  ;;  %v1379_v54 = vadd.f32 %v1378_v51, %v5119_v43  ;;  %4304 = vmatmul.mubr.msk.f32.vlgmr.msra.gmra.mrb[64].mxu0 %vm1024_vm1, %v5147_v46  ;;  %4308 = vmatmul.mubr.msk.f32.vlgmr.msra.gmra.mrb[64].mxu1 %vm1024_vm1, %v5147_v46 }
 0x25b   : > { %v1771_v27 = vmax.f32 %v1377_v48, 0.0  ;;  %v1770_v57 = vmax.f32 %v1290_v50, 0.0  ;;  %v1293_v58 = vpop.f32.mrb[44].mxu0  ;;  %1916 = vmatprep.mubr.f32.mxu0 %v4704_v6  ;;  %2005 = vmatprep.mubr.f32.mxu1 %v4704_v6 }
 0x25c   : > { %v4494_v61 = vpack.c.bf16 %v1769_v53, %v1753_v52  ;;  %v1772_v0 = vmax.f32 %v1379_v54, 0.0  ;;  %v1382_v1 = vpop.f32.mrb[44].mxu1  ;;  %v1295_v2 = vpop.f32.mrb[45].mxu0  ;;  %v1294_v28 = vadd.f32 %v1293_v58, %v5123_v47 }
 0x25d   : > { %v4502_v3 = vpack.c.bf16 %v1771_v27, %v1755_v55  ;;  %v4492_v4 = vpack.c.bf16 %v1770_v57, %v1754_v56  ;;  %v1384_v5 = vpop.f32.mrb[45].mxu1  ;;  %v1383_v13 = vadd.f32 %v1382_v1, %v5123_v47  ;;  %v1296_v14 = vadd.f32 %v1295_v2, %v5123_v47 }
 0x25e   : > { %v4500_v11 = vpack.c.bf16 %v1772_v0, %v1756_v60  ;;  %4305 = vmatmul.mubr.msk.f32.gmra.mrb[66].mxu0 %vm1024_vm1, %v5163_v59  ;;  %4309 = vmatmul.mubr.msk.f32.gmra.mrb[66].mxu1 %vm1024_vm1, %v5163_v59  ;;  %v1385_v18 = vadd.f32 %v1384_v5, %v5123_v47  ;;  %v1785_v25 = vmax.f32 %v1294_v28, 0.0 }
 0x25f   : > { %v1299_v15 = vpop.f32.mrb[46].mxu0  ;;  %4493 = vmatprep.subr.bf16.mxu0 %v4492_v4  ;;  %1922 = vmatprep.mubr.f32.mxu0 %v4704_v6  ;;  %v1787_v29 = vmax.f32 %v1383_v13, 0.0  ;;  %v1786_v30 = vmax.f32 %v1296_v14, 0.0 }
 0x260   : > { %v1300_v19 = vadd.f32 %v1299_v15, %v5131_v12  ;;  %v1388_v20 = vpop.f32.mrb[46].mxu1  ;;  %4501 = vmatprep.subr.bf16.mxu1 %v4500_v11  ;;  %v1301_v21 = vpop.f32.mrb[47].mxu0  ;;  %4495 = vmatpush1.bf16.msra.mxu0 %v4494_v61  ;;  %v1788_v35 = vmax.f32 %v1385_v18, 0.0 }
 0x261   : > { %v1389_v22 = vadd.f32 %v1388_v20, %v5131_v12  ;;  %v1302_v23 = vadd.f32 %v1301_v21, %v5131_v12  ;;  %v1390_v24 = vpop.f32.mrb[47].mxu1  ;;  %4503 = vmatpush1.bf16.msra.mxu1 %v4502_v3  ;;  %2011 = vmatprep.mubr.f32.mxu1 %v4704_v6 }
 0x262   : > { %v1801_v26 = vmax.f32 %v1300_v19, 0.0  ;;  %v1391_v49 = vadd.f32 %v1390_v24, %v5131_v12  ;;  %4306 = vmatmul.mubr.msk.f32.gmra.mrb[68].mxu0 %vm1024_vm1, %v5176_v16  ;;  %4310 = vmatmul.mubr.msk.f32.gmra.mrb[68].mxu1 %vm1024_vm1, %v5176_v16 }
 0x263   : > { %v1803_v31 = vmax.f32 %v1389_v22, 0.0  ;;  %v1802_v32 = vmax.f32 %v1302_v23, 0.0  ;;  %v1459_v33 = vpop.f32.mrb[48].mxu0  ;;  %1928 = vmatprep.mubr.f32.mxu0 %v4704_v6  ;;  %2017 = vmatprep.mubr.f32.mxu1 %v4704_v6 }
 0x264   : > { %v4498_v37 = vpack.c.bf16 %v1801_v26, %v1785_v25  ;;  %v1804_v38 = vmax.f32 %v1391_v49, 0.0  ;;  %v1548_v39 = vpop.f32.mrb[48].mxu1  ;;  %v1461_v40 = vpop.f32.mrb[49].mxu0  ;;  %v1460_v36 = vadd.f32 %v1459_v33, %v5117_v63 }
 0x265   : > { %v4506_v62 = vpack.c.bf16 %v1803_v31, %v1787_v29  ;;  %v4496_v44 = vpack.c.bf16 %v1802_v32, %v1786_v30  ;;  %v1550_v17 = vpop.f32.mrb[49].mxu1  ;;  %v1549_v42 = vadd.f32 %v1548_v39, %v5117_v63  ;;  %v1462_v45 = vadd.f32 %v1461_v40, %v5117_v63 }
 0x266   : > { %v4504_v41 = vpack.c.bf16 %v1804_v38, %v1788_v35  ;;  %4307 = vmatmul.mubr.msk.f32.gmra.mrb[70].mxu0 %vm1024_vm1, %v5193_v34  ;;  %4311 = vmatmul.mubr.msk.f32.gmra.mrb[70].mxu1 %vm1024_vm1, %v5193_v34  ;;  %v1551_v8 = vadd.f32 %v1550_v17, %v5117_v63  ;;  %v1757_v53 = vmax.f32 %v1460_v36, 0.0 }
 0x267   : > { %v1465_v7 = vpop.f32.mrb[50].mxu0  ;;  %4497 = vmatprep.subr.bf16.mxu0 %v4496_v44  ;;  %2088 = vmatprep.mubr.f32.mxu0 %v4704_v6  ;;  %v1759_v56 = vmax.f32 %v1549_v42, 0.0  ;;  %v1758_v27 = vmax.f32 %v1462_v45, 0.0 }
 0x268   : > { %v1466_v9 = vadd.f32 %v1465_v7, %v5119_v43  ;;  %v1554_v10 = vpop.f32.mrb[50].mxu1  ;;  %4505 = vmatprep.subr.bf16.mxu1 %v4504_v41  ;;  %v1467_v48 = vpop.f32.mrb[51].mxu0  ;;  %4499 = vmatpush1.bf16.msra.mxu0 %v4498_v37  ;;  %v1760_v61 = vmax.f32 %v1551_v8, 0.0 }
 0x269   : > { %v1555_v50 = vadd.f32 %v1554_v10, %v5119_v43  ;;  %v1468_v51 = vadd.f32 %v1467_v48, %v5119_v43  ;;  %v1556_v52 = vpop.f32.mrb[51].mxu1  ;;  %4507 = vmatpush1.bf16.msra.mxu1 %v4506_v62  ;;  %2177 = vmatprep.mubr.f32.mxu1 %v4704_v6 }
 0x26a   : > { %v1773_v54 = vmax.f32 %v1466_v9, 0.0  ;;  %v1557_v55 = vadd.f32 %v1556_v52, %v5119_v43 }
 0x26b   : > { %v1775_v57 = vmax.f32 %v1555_v50, 0.0  ;;  %v1774_v58 = vmax.f32 %v1468_v51, 0.0  ;;  %v1471_v60 = vpop.f32.mrb[52].mxu0  ;;  %4312 = vmatmul.mubr.msk.f32.vlgmr.msra.gmra.mrb[72].mxu0 %vm1024_vm1, %v5147_v46 }
 0x26c   : > { %v4510_v0 = vpack.c.bf16 %v1773_v54, %v1757_v53  ;;  %v1776_v1 = vmax.f32 %v1557_v55, 0.0  ;;  %v1560_v2 = vpop.f32.mrb[52].mxu1  ;;  %4316 = vmatmul.mubr.msk.f32.vlgmr.msra.gmra.mrb[72].mxu1 %vm1024_vm1, %v5147_v46  ;;  %v1473_v3 = vpop.f32.mrb[53].mxu0  ;;  %2094 = vmatprep.mubr.f32.mxu0 %v4704_v6  ;;  %v1472_v13 = vadd.f32 %v1471_v60, %v5123_v47 }
 0x26d   : > { %v4518_v4 = vpack.c.bf16 %v1775_v57, %v1759_v56  ;;  %v4508_v5 = vpack.c.bf16 %v1774_v58, %v1758_v27  ;;  %v1562_v11 = vpop.f32.mrb[53].mxu1  ;;  %2183 = vmatprep.mubr.f32.mxu1 %v4704_v6  ;;  %v1561_v14 = vadd.f32 %v1560_v2, %v5123_v47  ;;  %v1474_v15 = vadd.f32 %v1473_v3, %v5123_v47 }
 0x26e   : > { %v4516_v28 = vpack.c.bf16 %v1776_v1, %v1760_v61  ;;  %v1563_v19 = vadd.f32 %v1562_v11, %v5123_v47  ;;  %v1789_v26 = vmax.f32 %v1472_v13, 0.0 }
 0x26f   : > { %v1477_v18 = vpop.f32.mrb[54].mxu0  ;;  %4313 = vmatmul.mubr.msk.f32.gmra.mrb[74].mxu0 %vm1024_vm1, %v5163_v59  ;;  %4509 = vmatprep.subr.bf16.mxu0 %v4508_v5  ;;  %v1791_v30 = vmax.f32 %v1561_v14, 0.0  ;;  %v1790_v31 = vmax.f32 %v1474_v15, 0.0 }
 0x270   : > { %v1478_v20 = vadd.f32 %v1477_v18, %v5131_v12  ;;  %v1566_v21 = vpop.f32.mrb[54].mxu1  ;;  %4317 = vmatmul.mubr.msk.f32.gmra.mrb[74].mxu1 %vm1024_vm1, %v5163_v59  ;;  %4517 = vmatprep.subr.bf16.mxu1 %v4516_v28  ;;  %v1479_v22 = vpop.f32.mrb[55].mxu0  ;;  %v1792_v37 = vmax.f32 %v1563_v19, 0.0 }
 0x271   : > { %v1567_v23 = vadd.f32 %v1566_v21, %v5131_v12  ;;  %v1480_v24 = vadd.f32 %v1479_v22, %v5131_v12  ;;  %v1568_v25 = vpop.f32.mrb[55].mxu1  ;;  %4511 = vmatpush1.bf16.msra.mxu0 %v4510_v0  ;;  %4519 = vmatpush1.bf16.msra.mxu1 %v4518_v4 }
 0x272   : > { %v1805_v49 = vmax.f32 %v1478_v20, 0.0  ;;  %v1569_v29 = vadd.f32 %v1568_v25, %v5131_v12  ;;  %2100 = vmatprep.mubr.f32.mxu0 %v4704_v6  ;;  %2189 = vmatprep.mubr.f32.mxu1 %v4704_v6 }
 0x273   : > { %v1807_v32 = vmax.f32 %v1567_v23, 0.0  ;;  %v1806_v33 = vmax.f32 %v1480_v24, 0.0  ;;  %v1637_v35 = vpop.f32.mrb[56].mxu0  ;;  %4314 = vmatmul.mubr.msk.f32.gmra.mrb[76].mxu0 %vm1024_vm1, %v5176_v16 }
 0x274   : > { %v4514_v38 = vpack.c.bf16 %v1805_v49, %v1789_v26  ;;  %v1808_v39 = vmax.f32 %v1569_v29, 0.0  ;;  %v1726_v40 = vpop.f32.mrb[56].mxu1  ;;  %4318 = vmatmul.mubr.msk.f32.gmra.mrb[76].mxu1 %vm1024_vm1, %v5176_v16  ;;  %v1639_v62 = vpop.f32.mrb[57].mxu0  ;;  %2106 = vmatprep.mubr.f32.mxu0 %v4704_v6  ;;  %v1638_v42 = vadd.f32 %v1637_v35, %v5117_v63 }
 0x275   : > { %v4522_v44 = vpack.c.bf16 %v1807_v32, %v1791_v30  ;;  %v4512_v17 = vpack.c.bf16 %v1806_v33, %v1790_v31  ;;  %v1728_v41 = vpop.f32.mrb[57].mxu1  ;;  %2195 = vmatprep.mubr.f32.mxu1 %v4704_v6  ;;  %v1727_v45 = vadd.f32 %v1726_v40, %v5117_v63  ;;  %v1640_v7 = vadd.f32 %v1639_v62, %v5117_v63  ;;  %v4695_v40 = vld [vmem:[%s4765_s29 + $0x18] sm:$0xff]  ;;  %v5312_v62 = vpop.permute.xlu0 %1819 }
 0x276   : > { %v4520_v36 = vpack.c.bf16 %v1808_v39, %v1792_v37  ;;  %v1729_v9 = vadd.f32 %v1728_v41, %v5117_v63  ;;  %v1761_v54 = vmax.f32 %v1638_v42, 0.0  ;;  %v4694_v39 = vld [vmem:[%s4765_s29 + $0x10] sm:$0xff] }
 0x277   : > { %v1643_v8 = vpop.f32.mrb[58].mxu0  ;;  %4315 = vmatmul.mubr.msk.f32.gmra.mrb[78].mxu0 %vm1024_vm1, %v5193_v34  ;;  %4513 = vmatprep.subr.bf16.mxu0 %v4512_v17  ;;  %v1763_v63 = vmax.f32 %v1727_v45, 0.0  ;;  %v1762_v27 = vmax.f32 %v1640_v7, 0.0 }
 0x278   : > { %v1644_v10 = vadd.f32 %v1643_v8, %v5119_v43  ;;  %v1732_v48 = vpop.f32.mrb[58].mxu1  ;;  %4319 = vmatmul.mubr.msk.f32.gmra.mrb[78].mxu1 %vm1024_vm1, %v5193_v34  ;;  %4521 = vmatprep.subr.bf16.mxu1 %v4520_v36  ;;  %v1645_v50 = vpop.f32.mrb[59].mxu0  ;;  %v1764_v61 = vmax.f32 %v1729_v9, 0.0 }
 0x279   : > { %v1733_v51 = vadd.f32 %v1732_v48, %v5119_v43  ;;  %v1646_v52 = vadd.f32 %v1645_v50, %v5119_v43  ;;  %v1734_v53 = vpop.f32.mrb[59].mxu1  ;;  %4515 = vmatpush1.bf16.msra.mxu0 %v4514_v38  ;;  %4523 = vmatpush1.bf16.msra.mxu1 %v4522_v44 }
 0x27a   : > { %v1777_v55 = vmax.f32 %v1644_v10, 0.0  ;;  %v1735_v56 = vadd.f32 %v1734_v53, %v5119_v43  ;;  %2266 = vmatprep.mubr.f32.mxu0 %v4704_v6  ;;  %2355 = vmatprep.mubr.f32.mxu1 %v4704_v6 }
 0x27b   : > { %v1779_v57 = vmax.f32 %v1733_v51, 0.0  ;;  %v1778_v58 = vmax.f32 %v1646_v52, 0.0  ;;  %v1649_v60 = vpop.f32.mrb[60].mxu0 }
 0x27c   : > { %v4526_v0 = vpack.c.bf16 %v1777_v55, %v1761_v54  ;;  %v1780_v1 = vmax.f32 %v1735_v56, 0.0  ;;  %v1738_v2 = vpop.f32.mrb[60].mxu1  ;;  %4320 = vmatmul.mubr.msk.f32.vlgmr.msra.gmra.mrb[80].mxu0 %vm1024_vm1, %v5147_v46  ;;  %4324 = vmatmul.mubr.msk.f32.vlgmr.msra.gmra.mrb[80].mxu1 %vm1024_vm1, %v5147_v46  ;;  %v1651_v43 = vpop.f32.mrb[61].mxu0  ;;  %v1650_v28 = vadd.f32 %v1649_v60, %v5123_v47 }
 0x27d   : > { %v4534_v3 = vpack.c.bf16 %v1779_v57, %v1763_v63  ;;  %v4524_v4 = vpack.c.bf16 %v1778_v58, %v1762_v27  ;;  %v1740_v5 = vpop.f32.mrb[61].mxu1  ;;  %2272 = vmatprep.mubr.f32.mxu0 %v4704_v6  ;;  %2361 = vmatprep.mubr.f32.mxu1 %v4704_v6  ;;  %v1739_v13 = vadd.f32 %v1738_v2, %v5123_v47 }
 0x27e   : > { %v4532_v11 = vpack.c.bf16 %v1780_v1, %v1764_v61  ;;  %v1652_v14 = vadd.f32 %v1651_v43, %v5123_v47  ;;  %v1741_v18 = vadd.f32 %v1740_v5, %v5123_v47  ;;  %v1793_v25 = vmax.f32 %v1650_v28, 0.0 }
 0x27f   : > { %v1655_v15 = vpop.f32.mrb[62].mxu0  ;;  %4525 = vmatprep.subr.bf16.mxu0 %v4524_v4  ;;  %v1795_v49 = vmax.f32 %v1739_v13, 0.0  ;;  %v5326_v13 = vpop.permute.xlu0 %1831 }
 0x280   : > { %v1656_v19 = vadd.f32 %v1655_v15, %v5131_v12  ;;  %v1744_v20 = vpop.f32.mrb[62].mxu1  ;;  %4321 = vmatmul.mubr.msk.f32.gmra.mrb[82].mxu0 %vm1024_vm1, %v5163_v59  ;;  %4325 = vmatmul.mubr.msk.f32.gmra.mrb[82].mxu1 %vm1024_vm1, %v5163_v59  ;;  %v1657_v21 = vpop.f32.mrb[63].mxu0  ;;  %v1794_v29 = vmax.f32 %v1652_v14, 0.0  ;;  %v1796_v32 = vmax.f32 %v1741_v18, 0.0 }
 0x281   : > { %v1745_v22 = vadd.f32 %v1744_v20, %v5131_v12  ;;  %4533 = vmatprep.subr.bf16.mxu1 %v4532_v11  ;;  %v1658_v23 = vadd.f32 %v1657_v21, %v5131_v12  ;;  %v1746_v24 = vpop.f32.mrb[63].mxu1  ;;  %4527 = vmatpush1.bf16.msra.mxu0 %v4526_v0 }
 0x282   : > { %v1809_v26 = vmax.f32 %v1656_v19, 0.0  ;;  %v1747_v47 = vadd.f32 %v1746_v24, %v5131_v12  ;;  %4535 = vmatpush1.bf16.msra.mxu1 %v4534_v3  ;;  %2278 = vmatprep.mubr.f32.mxu0 %v4704_v6 }
 0x283   : > { %v1811_v30 = vmax.f32 %v1745_v22, 0.0  ;;  %v1810_v31 = vmax.f32 %v1658_v23, 0.0  ;;  %2367 = vmatprep.mubr.f32.mxu1 %v4704_v6 }
 0x284   : > { %v4530_v33 = vpack.c.bf16 %v1809_v26, %v1793_v25  ;;  %v1812_v35 = vmax.f32 %v1747_v47, 0.0  ;;  %4322 = vmatmul.mubr.msk.f32.gmra.mrb[84].mxu0 %vm1024_vm1, %v5176_v16  ;;  %4326 = vmatmul.mubr.msk.f32.gmra.mrb[84].mxu1 %vm1024_vm1, %v5176_v16 }
 0x285   : > { %v4538_v37 = vpack.c.bf16 %v1811_v30, %v1795_v49  ;;  %v4528_v12 = vpack.c.bf16 %v1810_v31, %v1794_v29  ;;  %2284 = vmatprep.mubr.f32.mxu0 %v4704_v6  ;;  %2373 = vmatprep.mubr.f32.mxu1 %v4704_v6 }
 0x286   : > { %v4536_v38 = vpack.c.bf16 %v1812_v35, %v1796_v32 }
 0x287   : > { %4529 = vmatprep.subr.bf16.mxu0 %v4528_v12 }
 0x288   : > { %4323 = vmatmul.mubr.msk.f32.gmra.mrb[86].mxu0 %vm1024_vm1, %v5193_v34  ;;  %4327 = vmatmul.mubr.msk.f32.gmra.mrb[86].mxu1 %vm1024_vm1, %v5193_v34 }
 0x289   : > { %4537 = vmatprep.subr.bf16.mxu1 %v4536_v38  ;;  %4531 = vmatpush1.bf16.msra.mxu0 %v4530_v33 }
 0x28a   : > { %4539 = vmatpush1.bf16.msra.mxu1 %v4538_v37  ;;  %2444 = vmatprep.mubr.f32.mxu0 %v4704_v6 }
 0x28b   : > { %2533 = vmatprep.mubr.f32.mxu1 %v4704_v6 }
 0x28c   : > { %4328 = vmatmul.mubr.msk.f32.vlgmr.msra.gmra.mrb[88].mxu0 %vm1024_vm1, %v5147_v46 }
 0x28d   : > { %4332 = vmatmul.mubr.msk.f32.vlgmr.msra.gmra.mrb[88].mxu1 %vm1024_vm1, %v5147_v46  ;;  %2450 = vmatprep.mubr.f32.mxu0 %v4704_v6  ;;  %v4709_v46 = vmov 3  }
 0x28e   : > { %2539 = vmatprep.mubr.f32.mxu1 %v4704_v6  ;;  %4689 = vset.pattern.permute.xlu1 %v4709_v46 }
 0x28f   : > { %4690 = vset.pattern.permute.xlu0 %v4709_v46 }
 0x290   : > { %4329 = vmatmul.mubr.msk.f32.gmra.mrb[90].mxu0 %vm1024_vm1, %v5163_v59 }
 0x291   : > { %4333 = vmatmul.mubr.msk.f32.gmra.mrb[90].mxu1 %vm1024_vm1, %v5163_v59  ;;  %2456 = vmatprep.mubr.f32.mxu0 %v4704_v6  ;;  %v5306_v59 = vld [vmem:[%s4765_s29] sm:$0xff] }
 0x292   : > { %2545 = vmatprep.mubr.f32.mxu1 %v4704_v6  ;;  %2628 = vperm.xlu1 %4689, %v5306_v59  }
 0x294   : > { %4330 = vmatmul.mubr.msk.f32.gmra.mrb[92].mxu0 %vm1024_vm1, %v5176_v16 }
 0x295   : > { %4334 = vmatmul.mubr.msk.f32.gmra.mrb[92].mxu1 %vm1024_vm1, %v5176_v16  ;;  %2462 = vmatprep.mubr.f32.mxu0 %v4704_v6  ;;  %v4693_v16 = vld [vmem:[%s4765_s29 + $0x8] sm:$0xff] }
 0x296   : > { %2551 = vmatprep.mubr.f32.mxu1 %v4704_v6  ;;  %2632 = vperm.xlu0 %4690, %v4693_v16  }
 0x297   : > { %2636 = vperm.xlu1 %4689, %v4694_v39  }
 0x298   : > { %4331 = vmatmul.mubr.msk.f32.gmra.mrb[94].mxu0 %vm1024_vm1, %v5193_v34 }
 0x299   : > { %4335 = vmatmul.mubr.msk.f32.gmra.mrb[94].mxu1 %vm1024_vm1, %v5193_v34  ;;  %2719 = vmatprep.mubr.f32.mxu0 %v4704_v6  ;;  %v5314_v34 = vpop.permute.xlu1 %1823 }
 0x29a   : > { %2808 = vmatprep.mubr.f32.mxu1 %v4704_v6 }
 0x29b   : > { %2640 = vperm.xlu1 %4689, %v4695_v40  }
 0x29d   : > { %v5324_v57 = vpop.permute.xlu1 %1827 }
 0x32d   : > { %v1912_v44 = vpop.f32.mrb[64].mxu0  ;;  %v2001_v17 = vpop.f32.mrb[64].mxu1 }
 0x32e   : > { %v1914_v41 = vpop.f32.mrb[65].mxu0  ;;  %v2003_v36 = vpop.f32.mrb[65].mxu1  ;;  %v1913_v42 = vadd.f32 %v1912_v44, %v5312_v62  ;;  %v2002_v45 = vadd.f32 %v2001_v17, %v5312_v62 }
 0x32f   : > { %v1915_v7 = vadd.f32 %v1914_v41, %v5312_v62  ;;  %v2004_v8 = vadd.f32 %v2003_v36, %v5312_v62 }
 0x330   : > { %v2558_v55 = vmax.f32 %v1913_v42, 0.0  ;;  %v2560_v63 = vmax.f32 %v2002_v45, 0.0 }
 0x331   : > { %v1918_v9 = vpop.f32.mrb[66].mxu0  ;;  %v2007_v10 = vpop.f32.mrb[66].mxu1  ;;  %v2559_v58 = vmax.f32 %v1915_v7, 0.0  ;;  %v2561_v60 = vmax.f32 %v2004_v8, 0.0  ;;  %v5342_v7 = vld [vmem:[%s5723_s1 + $0x40] sm:$0xff] }
 0x332   : > { %v1919_v48 = vadd.f32 %v1918_v9, %v5314_v34  ;;  %v2008_v50 = vadd.f32 %v2007_v10, %v5314_v34  ;;  %v1920_v51 = vpop.f32.mrb[67].mxu0  ;;  %v2009_v52 = vpop.f32.mrb[67].mxu1 }
 0x333   : > { %v1921_v53 = vadd.f32 %v1920_v51, %v5314_v34  ;;  %v2010_v54 = vadd.f32 %v2009_v52, %v5314_v34 }
 0x334   : > { %v2574_v56 = vmax.f32 %v1919_v48, 0.0  ;;  %v2576_v27 = vmax.f32 %v2008_v50, 0.0 }
 0x335   : > { %v2575_v61 = vmax.f32 %v1921_v53, 0.0  ;;  %v2577_v0 = vmax.f32 %v2010_v54, 0.0  ;;  %v1924_v1 = vpop.f32.mrb[68].mxu0  ;;  %v2013_v2 = vpop.f32.mrb[68].mxu1 }
 0x336   : > { %v4542_v43 = vpack.c.bf16 %v2574_v56, %v2558_v55  ;;  %v4550_v3 = vpack.c.bf16 %v2576_v27, %v2560_v63  ;;  %v1926_v4 = vpop.f32.mrb[69].mxu0  ;;  %v2015_v5 = vpop.f32.mrb[69].mxu1  ;;  %v1925_v14 = vadd.f32 %v1924_v1, %v5324_v57  ;;  %v2014_v15 = vadd.f32 %v2013_v2, %v5324_v57 }
 0x337   : > { %v4540_v11 = vpack.c.bf16 %v2575_v61, %v2559_v58  ;;  %v4548_v28 = vpack.c.bf16 %v2577_v0, %v2561_v60  ;;  %v1927_v18 = vadd.f32 %v1926_v4, %v5324_v57  ;;  %v2016_v19 = vadd.f32 %v2015_v5, %v5324_v57  ;;  %v5358_v61 = vld [vmem:[%s5723_s1 + $0x48] sm:$0xff] }
 0x338   : > { %v2590_v49 = vmax.f32 %v1925_v14, 0.0  ;;  %v2592_v29 = vmax.f32 %v2014_v15, 0.0 }
 0x339   : > { %v1930_v20 = vpop.f32.mrb[70].mxu0  ;;  %v2019_v21 = vpop.f32.mrb[70].mxu1  ;;  %4541 = vmatprep.subr.bf16.mxu0 %v4540_v11  ;;  %4549 = vmatprep.subr.bf16.mxu1 %v4548_v28  ;;  %v2591_v32 = vmax.f32 %v1927_v18, 0.0  ;;  %v2593_v33 = vmax.f32 %v2016_v19, 0.0 }
 0x33a   : > { %v1931_v22 = vadd.f32 %v1930_v20, %v5326_v13  ;;  %v2020_v23 = vadd.f32 %v2019_v21, %v5326_v13  ;;  %v1932_v24 = vpop.f32.mrb[71].mxu0  ;;  %v2021_v25 = vpop.f32.mrb[71].mxu1  ;;  %4543 = vmatpush1.bf16.msra.mxu0 %v4542_v43  ;;  %4551 = vmatpush1.bf16.msra.mxu1 %v4550_v3  ;;  %v5371_v20 = vld [vmem:[%s5723_s1 + $0x50] sm:$0xff] }
 0x33b   : > { %v1933_v26 = vadd.f32 %v1932_v24, %v5326_v13  ;;  %v2022_v47 = vadd.f32 %v2021_v25, %v5326_v13 }
 0x33c   : > { %v2606_v30 = vmax.f32 %v1931_v22, 0.0  ;;  %v2608_v31 = vmax.f32 %v2020_v23, 0.0 }
 0x33d   : > { %v2607_v35 = vmax.f32 %v1933_v26, 0.0  ;;  %v2609_v37 = vmax.f32 %v2022_v47, 0.0 }
 0x33e   : > { %v4546_v12 = vpack.c.bf16 %v2606_v30, %v2590_v49  ;;  %v4554_v38 = vpack.c.bf16 %v2608_v31, %v2592_v29  ;;  %v2090_v46 = vpop.f32.mrb[72].mxu0 }
 0x33f   : > { %v4544_v16 = vpack.c.bf16 %v2607_v35, %v2591_v32  ;;  %v4552_v39 = vpack.c.bf16 %v2609_v37, %v2593_v33  ;;  %v2179_v40 = vpop.f32.mrb[72].mxu1  ;;  %v2092_v44 = vpop.f32.mrb[73].mxu0  ;;  %v2091_v41 = vadd.f32 %v2090_v46, %v5312_v62  ;;  %v5388_v37 = vld [vmem:[%s5723_s1 + $0x58] sm:$0xff] }
 0x340   : > { %v2181_v17 = vpop.f32.mrb[73].mxu1  ;;  %v2180_v36 = vadd.f32 %v2179_v40, %v5312_v62  ;;  %v2093_v42 = vadd.f32 %v2092_v44, %v5312_v62 }
 0x341   : > { %4545 = vmatprep.subr.bf16.mxu0 %v4544_v16  ;;  %4553 = vmatprep.subr.bf16.mxu1 %v4552_v39  ;;  %v2182_v8 = vadd.f32 %v2181_v17, %v5312_v62  ;;  %v2562_v53 = vmax.f32 %v2091_v41, 0.0 }
 0x342   : > { %v2096_v45 = vpop.f32.mrb[74].mxu0  ;;  %4547 = vmatpush1.bf16.msra.mxu0 %v4546_v12  ;;  %4555 = vmatpush1.bf16.msra.mxu1 %v4554_v38  ;;  %v2564_v56 = vmax.f32 %v2180_v36, 0.0  ;;  %v2563_v63 = vmax.f32 %v2093_v42, 0.0 }
 0x343   : > { %v2097_v9 = vadd.f32 %v2096_v45, %v5314_v34  ;;  %v2185_v10 = vpop.f32.mrb[74].mxu1  ;;  %v2098_v48 = vpop.f32.mrb[75].mxu0  ;;  %v2565_v0 = vmax.f32 %v2182_v8, 0.0 }
 0x344   : > { %v2186_v50 = vadd.f32 %v2185_v10, %v5314_v34  ;;  %v2099_v51 = vadd.f32 %v2098_v48, %v5314_v34  ;;  %v2187_v52 = vpop.f32.mrb[75].mxu1 }
 0x345   : > { %v2578_v54 = vmax.f32 %v2097_v9, 0.0  ;;  %v2188_v55 = vadd.f32 %v2187_v52, %v5314_v34  ;;  %4340 = vmatmul.mubr.msk.f32.vlgmr.msra.gmra.mrb[96].mxu0 %vm1024_vm1, %v5342_v7  ;;  %4344 = vmatmul.mubr.msk.f32.vlgmr.msra.gmra.mrb[96].mxu1 %vm1024_vm1, %v5342_v7 }
 0x346   : > { %v2580_v27 = vmax.f32 %v2186_v50, 0.0  ;;  %v2579_v58 = vmax.f32 %v2099_v51, 0.0  ;;  %v2102_v60 = vpop.f32.mrb[76].mxu0  ;;  %2725 = vmatprep.mubr.f32.mxu0 %v4704_v6  ;;  %2814 = vmatprep.mubr.f32.mxu1 %v4704_v6 }
 0x347   : > { %v4558_v1 = vpack.c.bf16 %v2578_v54, %v2562_v53  ;;  %v2581_v2 = vmax.f32 %v2188_v55, 0.0  ;;  %v2191_v43 = vpop.f32.mrb[76].mxu1  ;;  %v2104_v3 = vpop.f32.mrb[77].mxu0  ;;  %v2103_v14 = vadd.f32 %v2102_v60, %v5324_v57 }
 0x348   : > { %v4566_v4 = vpack.c.bf16 %v2580_v27, %v2564_v56  ;;  %v4556_v5 = vpack.c.bf16 %v2579_v58, %v2563_v63  ;;  %v2193_v11 = vpop.f32.mrb[77].mxu1  ;;  %v2192_v15 = vadd.f32 %v2191_v43, %v5324_v57  ;;  %v2105_v18 = vadd.f32 %v2104_v3, %v5324_v57 }
 0x349   : > { %v4564_v28 = vpack.c.bf16 %v2581_v2, %v2565_v0  ;;  %4341 = vmatmul.mubr.msk.f32.gmra.mrb[98].mxu0 %vm1024_vm1, %v5358_v61  ;;  %4345 = vmatmul.mubr.msk.f32.gmra.mrb[98].mxu1 %vm1024_vm1, %v5358_v61  ;;  %v2194_v21 = vadd.f32 %v2193_v11, %v5324_v57  ;;  %v2594_v49 = vmax.f32 %v2103_v14, 0.0 }
 0x34a   : > { %v2108_v19 = vpop.f32.mrb[78].mxu0  ;;  %4557 = vmatprep.subr.bf16.mxu0 %v4556_v5  ;;  %2731 = vmatprep.mubr.f32.mxu0 %v4704_v6  ;;  %v2596_v31 = vmax.f32 %v2192_v15, 0.0  ;;  %v2595_v32 = vmax.f32 %v2105_v18, 0.0 }
 0x34b   : > { %v2109_v22 = vadd.f32 %v2108_v19, %v5326_v13  ;;  %v2197_v23 = vpop.f32.mrb[78].mxu1  ;;  %4565 = vmatprep.subr.bf16.mxu1 %v4564_v28  ;;  %v2110_v24 = vpop.f32.mrb[79].mxu0  ;;  %4559 = vmatpush1.bf16.msra.mxu0 %v4558_v1  ;;  %v2597_v12 = vmax.f32 %v2194_v21, 0.0 }
 0x34c   : > { %v2198_v25 = vadd.f32 %v2197_v23, %v5326_v13  ;;  %v2111_v26 = vadd.f32 %v2110_v24, %v5326_v13  ;;  %v2199_v47 = vpop.f32.mrb[79].mxu1  ;;  %4567 = vmatpush1.bf16.msra.mxu1 %v4566_v4  ;;  %2820 = vmatprep.mubr.f32.mxu1 %v4704_v6 }
 0x34d   : > { %v2610_v29 = vmax.f32 %v2109_v22, 0.0  ;;  %v2200_v30 = vadd.f32 %v2199_v47, %v5326_v13  ;;  %4342 = vmatmul.mubr.msk.f32.gmra.mrb[100].mxu0 %vm1024_vm1, %v5371_v20  ;;  %4346 = vmatmul.mubr.msk.f32.gmra.mrb[100].mxu1 %vm1024_vm1, %v5371_v20 }
 0x34e   : > { %v2612_v33 = vmax.f32 %v2198_v25, 0.0  ;;  %v2611_v35 = vmax.f32 %v2111_v26, 0.0  ;;  %2737 = vmatprep.mubr.f32.mxu0 %v4704_v6  ;;  %2826 = vmatprep.mubr.f32.mxu1 %v4704_v6 }
 0x34f   : > { %v4562_v38 = vpack.c.bf16 %v2610_v29, %v2594_v49  ;;  %v2613_v46 = vmax.f32 %v2200_v30, 0.0  ;;  %v2268_v16 = vpop.f32.mrb[80].mxu0  ;;  %v2357_v39 = vpop.f32.mrb[80].mxu1 }
 0x350   : > { %v4570_v40 = vpack.c.bf16 %v2612_v33, %v2596_v31  ;;  %v4560_v44 = vpack.c.bf16 %v2611_v35, %v2595_v32  ;;  %v2270_v17 = vpop.f32.mrb[81].mxu0  ;;  %v2359_v41 = vpop.f32.mrb[81].mxu1  ;;  %v2269_v42 = vadd.f32 %v2268_v16, %v5312_v62  ;;  %v2358_v45 = vadd.f32 %v2357_v39, %v5312_v62 }
 0x351   : > { %v4568_v36 = vpack.c.bf16 %v2613_v46, %v2597_v12  ;;  %4343 = vmatmul.mubr.msk.f32.gmra.mrb[102].mxu0 %vm1024_vm1, %v5388_v37  ;;  %4347 = vmatmul.mubr.msk.f32.gmra.mrb[102].mxu1 %vm1024_vm1, %v5388_v37  ;;  %v2271_v8 = vadd.f32 %v2270_v17, %v5312_v62  ;;  %v2360_v9 = vadd.f32 %v2359_v41, %v5312_v62 }
 0x352   : > { %4561 = vmatprep.subr.bf16.mxu0 %v4560_v44  ;;  %2897 = vmatprep.mubr.f32.mxu0 %v4704_v6  ;;  %v2566_v56 = vmax.f32 %v2269_v42, 0.0  ;;  %v2568_v63 = vmax.f32 %v2358_v45, 0.0 }
 0x353   : > { %v2274_v10 = vpop.f32.mrb[82].mxu0  ;;  %v2363_v48 = vpop.f32.mrb[82].mxu1  ;;  %4569 = vmatprep.subr.bf16.mxu1 %v4568_v36  ;;  %4563 = vmatpush1.bf16.msra.mxu0 %v4562_v38  ;;  %v2567_v60 = vmax.f32 %v2271_v8, 0.0  ;;  %v2569_v0 = vmax.f32 %v2360_v9, 0.0 }
 0x354   : > { %v2275_v50 = vadd.f32 %v2274_v10, %v5314_v34  ;;  %v2364_v51 = vadd.f32 %v2363_v48, %v5314_v34  ;;  %v2276_v52 = vpop.f32.mrb[83].mxu0  ;;  %v2365_v53 = vpop.f32.mrb[83].mxu1  ;;  %4571 = vmatpush1.bf16.msra.mxu1 %v4570_v40  ;;  %2986 = vmatprep.mubr.f32.mxu1 %v4704_v6 }
 0x355   : > { %v2277_v54 = vadd.f32 %v2276_v52, %v5314_v34  ;;  %v2366_v55 = vadd.f32 %v2365_v53, %v5314_v34 }
 0x356   : > { %v2582_v27 = vmax.f32 %v2275_v50, 0.0  ;;  %v2584_v58 = vmax.f32 %v2364_v51, 0.0  ;;  %4348 = vmatmul.mubr.msk.f32.vlgmr.msra.gmra.mrb[104].mxu0 %vm1024_vm1, %v5342_v7 }
 0x357   : > { %v2583_v1 = vmax.f32 %v2277_v54, 0.0  ;;  %v2585_v2 = vmax.f32 %v2366_v55, 0.0  ;;  %v2280_v43 = vpop.f32.mrb[84].mxu0  ;;  %v2369_v3 = vpop.f32.mrb[84].mxu1  ;;  %4352 = vmatmul.mubr.msk.f32.vlgmr.msra.gmra.mrb[104].mxu1 %vm1024_vm1, %v5342_v7  ;;  %2903 = vmatprep.mubr.f32.mxu0 %v4704_v6 }
 0x358   : > { %v4574_v4 = vpack.c.bf16 %v2582_v27, %v2566_v56  ;;  %v4582_v5 = vpack.c.bf16 %v2584_v58, %v2568_v63  ;;  %v2282_v11 = vpop.f32.mrb[85].mxu0  ;;  %v2371_v28 = vpop.f32.mrb[85].mxu1  ;;  %2992 = vmatprep.mubr.f32.mxu1 %v4704_v6  ;;  %v2281_v18 = vadd.f32 %v2280_v43, %v5324_v57  ;;  %v2370_v19 = vadd.f32 %v2369_v3, %v5324_v57 }
 0x359   : > { %v4572_v14 = vpack.c.bf16 %v2583_v1, %v2567_v60  ;;  %v4580_v15 = vpack.c.bf16 %v2585_v2, %v2569_v0  ;;  %v2283_v21 = vadd.f32 %v2282_v11, %v5324_v57  ;;  %v2372_v22 = vadd.f32 %v2371_v28, %v5324_v57 }
 0x35a   : > { %4349 = vmatmul.mubr.msk.f32.gmra.mrb[106].mxu0 %vm1024_vm1, %v5358_v61  ;;  %v2598_v31 = vmax.f32 %v2281_v18, 0.0  ;;  %v2600_v32 = vmax.f32 %v2370_v19, 0.0 }
 0x35b   : > { %v2286_v23 = vpop.f32.mrb[86].mxu0  ;;  %v2375_v24 = vpop.f32.mrb[86].mxu1  ;;  %4353 = vmatmul.mubr.msk.f32.gmra.mrb[106].mxu1 %vm1024_vm1, %v5358_v61  ;;  %4573 = vmatprep.subr.bf16.mxu0 %v4572_v14  ;;  %v2599_v12 = vmax.f32 %v2283_v21, 0.0  ;;  %v2601_v38 = vmax.f32 %v2372_v22, 0.0 }
 0x35c   : > { %v2287_v25 = vadd.f32 %v2286_v23, %v5326_v13  ;;  %v2376_v26 = vadd.f32 %v2375_v24, %v5326_v13  ;;  %4581 = vmatprep.subr.bf16.mxu1 %v4580_v15  ;;  %v2288_v47 = vpop.f32.mrb[87].mxu0  ;;  %v2377_v49 = vpop.f32.mrb[87].mxu1  ;;  %4575 = vmatpush1.bf16.msra.mxu0 %v4574_v4 }
 0x35d   : > { %v2289_v29 = vadd.f32 %v2288_v47, %v5326_v13  ;;  %v2378_v30 = vadd.f32 %v2377_v49, %v5326_v13  ;;  %4583 = vmatpush1.bf16.msra.mxu1 %v4582_v5  ;;  %2909 = vmatprep.mubr.f32.mxu0 %v4704_v6 }
 0x35e   : > { %v2614_v33 = vmax.f32 %v2287_v25, 0.0  ;;  %v2616_v35 = vmax.f32 %v2376_v26, 0.0  ;;  %2998 = vmatprep.mubr.f32.mxu1 %v4704_v6  ;;  %4350 = vmatmul.mubr.msk.f32.gmra.mrb[108].mxu0 %vm1024_vm1, %v5371_v20 }
 0x35f   : > { %v2615_v46 = vmax.f32 %v2289_v29, 0.0  ;;  %v2617_v16 = vmax.f32 %v2378_v30, 0.0  ;;  %v2446_v39 = vpop.f32.mrb[88].mxu0  ;;  %4354 = vmatmul.mubr.msk.f32.gmra.mrb[108].mxu1 %vm1024_vm1, %v5371_v20  ;;  %2915 = vmatprep.mubr.f32.mxu0 %v4704_v6 }
 0x360   : > { %v4578_v40 = vpack.c.bf16 %v2614_v33, %v2598_v31  ;;  %v4586_v44 = vpack.c.bf16 %v2616_v35, %v2600_v32  ;;  %v2535_v17 = vpop.f32.mrb[88].mxu1  ;;  %v2448_v41 = vpop.f32.mrb[89].mxu0  ;;  %3004 = vmatprep.mubr.f32.mxu1 %v4704_v6  ;;  %v2447_v8 = vadd.f32 %v2446_v39, %v5312_v62 }
 0x361   : > { %v4576_v36 = vpack.c.bf16 %v2615_v46, %v2599_v12  ;;  %v4584_v42 = vpack.c.bf16 %v2617_v16, %v2601_v38  ;;  %v2537_v45 = vpop.f32.mrb[89].mxu1  ;;  %v2536_v9 = vadd.f32 %v2535_v17, %v5312_v62  ;;  %v2449_v10 = vadd.f32 %v2448_v41, %v5312_v62 }
 0x362   : > { %4351 = vmatmul.mubr.msk.f32.gmra.mrb[110].mxu0 %vm1024_vm1, %v5388_v37  ;;  %v2538_v50 = vadd.f32 %v2537_v45, %v5312_v62  ;;  %v2570_v63 = vmax.f32 %v2447_v8, 0.0 }
 0x363   : > { %v2452_v48 = vpop.f32.mrb[90].mxu0  ;;  %4355 = vmatmul.mubr.msk.f32.gmra.mrb[110].mxu1 %vm1024_vm1, %v5388_v37  ;;  %4577 = vmatprep.subr.bf16.mxu0 %v4576_v36  ;;  %v2572_v62 = vmax.f32 %v2536_v9, 0.0  ;;  %v2571_v60 = vmax.f32 %v2449_v10, 0.0  ;;  %v5503_v36 = vpop.permute.xlu0 %2632 }
 0x364   : > { %v2453_v51 = vadd.f32 %v2452_v48, %v5314_v34  ;;  %v2541_v52 = vpop.f32.mrb[90].mxu1  ;;  %4585 = vmatprep.subr.bf16.mxu1 %v4584_v42  ;;  %v2454_v53 = vpop.f32.mrb[91].mxu0  ;;  %4579 = vmatpush1.bf16.msra.mxu0 %v4578_v40  ;;  %v2573_v43 = vmax.f32 %v2538_v50, 0.0 }
 0x365   : > { %v2542_v54 = vadd.f32 %v2541_v52, %v5314_v34  ;;  %v2455_v55 = vadd.f32 %v2454_v53, %v5314_v34  ;;  %v2543_v56 = vpop.f32.mrb[91].mxu1  ;;  %4587 = vmatpush1.bf16.msra.mxu1 %v4586_v44  ;;  %3075 = vmatprep.mubr.f32.mxu0 %v4704_v6 }
 0x366   : > { %v2586_v27 = vmax.f32 %v2453_v51, 0.0  ;;  %v2544_v58 = vadd.f32 %v2543_v56, %v5314_v34  ;;  %3164 = vmatprep.mubr.f32.mxu1 %v4704_v6 }
 0x367   : > { %v2588_v0 = vmax.f32 %v2542_v54, 0.0  ;;  %v2587_v1 = vmax.f32 %v2455_v55, 0.0  ;;  %v2458_v2 = vpop.f32.mrb[92].mxu0  ;;  %4356 = vmatmul.mubr.msk.f32.vlgmr.msra.gmra.mrb[112].mxu0 %vm1024_vm1, %v5342_v7 }
 0x368   : > { %v4590_v3 = vpack.c.bf16 %v2586_v27, %v2570_v63  ;;  %v2589_v4 = vmax.f32 %v2544_v58, 0.0  ;;  %v2547_v5 = vpop.f32.mrb[92].mxu1  ;;  %4360 = vmatmul.mubr.msk.f32.vlgmr.msra.gmra.mrb[112].mxu1 %vm1024_vm1, %v5342_v7  ;;  %v2460_v11 = vpop.f32.mrb[93].mxu0  ;;  %3081 = vmatprep.mubr.f32.mxu0 %v4704_v6  ;;  %v2459_v18 = vadd.f32 %v2458_v2, %v5324_v57 }
 0x369   : > { %v4598_v34 = vpack.c.bf16 %v2588_v0, %v2572_v62  ;;  %v4588_v28 = vpack.c.bf16 %v2587_v1, %v2571_v60  ;;  %v2549_v14 = vpop.f32.mrb[93].mxu1  ;;  %3170 = vmatprep.mubr.f32.mxu1 %v4704_v6  ;;  %v2548_v19 = vadd.f32 %v2547_v5, %v5324_v57  ;;  %v2461_v21 = vadd.f32 %v2460_v11, %v5324_v57 }
 0x36a   : > { %v4596_v15 = vpack.c.bf16 %v2589_v4, %v2573_v43  ;;  %v2550_v23 = vadd.f32 %v2549_v14, %v5324_v57  ;;  %v2602_v30 = vmax.f32 %v2459_v18, 0.0 }
 0x36b   : > { %v2464_v22 = vpop.f32.mrb[94].mxu0  ;;  %4357 = vmatmul.mubr.msk.f32.gmra.mrb[114].mxu0 %vm1024_vm1, %v5358_v61  ;;  %4589 = vmatprep.subr.bf16.mxu0 %v4588_v28  ;;  %v2604_v57 = vmax.f32 %v2548_v19, 0.0  ;;  %v2603_v33 = vmax.f32 %v2461_v21, 0.0 }
 0x36c   : > { %v2465_v24 = vadd.f32 %v2464_v22, %v5326_v13  ;;  %v2553_v25 = vpop.f32.mrb[94].mxu1  ;;  %4361 = vmatmul.mubr.msk.f32.gmra.mrb[114].mxu1 %vm1024_vm1, %v5358_v61  ;;  %4597 = vmatprep.subr.bf16.mxu1 %v4596_v15  ;;  %v2466_v26 = vpop.f32.mrb[95].mxu0  ;;  %v2605_v38 = vmax.f32 %v2550_v23, 0.0 }
 0x36d   : > { %v2554_v47 = vadd.f32 %v2553_v25, %v5326_v13  ;;  %v2467_v49 = vadd.f32 %v2466_v26, %v5326_v13  ;;  %v2555_v29 = vpop.f32.mrb[95].mxu1  ;;  %4591 = vmatpush1.bf16.msra.mxu0 %v4590_v3  ;;  %4599 = vmatpush1.bf16.msra.mxu1 %v4598_v34 }
 0x36e   : > { %v2618_v31 = vmax.f32 %v2465_v24, 0.0  ;;  %v2556_v32 = vadd.f32 %v2555_v29, %v5326_v13  ;;  %3087 = vmatprep.mubr.f32.mxu0 %v4704_v6  ;;  %3176 = vmatprep.mubr.f32.mxu1 %v4704_v6 }
 0x36f   : > { %v2620_v35 = vmax.f32 %v2554_v47, 0.0  ;;  %v2619_v12 = vmax.f32 %v2467_v49, 0.0  ;;  %4358 = vmatmul.mubr.msk.f32.gmra.mrb[116].mxu0 %vm1024_vm1, %v5371_v20 }
 0x370   : > { %v4594_v46 = vpack.c.bf16 %v2618_v31, %v2602_v30  ;;  %v2621_v16 = vmax.f32 %v2556_v32, 0.0  ;;  %4362 = vmatmul.mubr.msk.f32.gmra.mrb[116].mxu1 %vm1024_vm1, %v5371_v20  ;;  %3093 = vmatprep.mubr.f32.mxu0 %v4704_v6 }
 0x371   : > { %v4602_v13 = vpack.c.bf16 %v2620_v35, %v2604_v57  ;;  %v4592_v39 = vpack.c.bf16 %v2619_v12, %v2603_v33  ;;  %3182 = vmatprep.mubr.f32.mxu1 %v4704_v6 }
 0x372   : > { %v4600_v40 = vpack.c.bf16 %v2621_v16, %v2605_v38 }
 0x373   : > { %4359 = vmatmul.mubr.msk.f32.gmra.mrb[118].mxu0 %vm1024_vm1, %v5388_v37  ;;  %4593 = vmatprep.subr.bf16.mxu0 %v4592_v39 }
 0x374   : > { %4363 = vmatmul.mubr.msk.f32.gmra.mrb[118].mxu1 %vm1024_vm1, %v5388_v37  ;;  %4601 = vmatprep.subr.bf16.mxu1 %v4600_v40 }
 0x375   : > { %4595 = vmatpush1.bf16.msra.mxu0 %v4594_v46  ;;  %4603 = vmatpush1.bf16.msra.mxu1 %v4602_v13 }
 0x376   : > { %3253 = vmatprep.mubr.f32.mxu0 %v4704_v6  ;;  %3342 = vmatprep.mubr.f32.mxu1 %v4704_v6 }
 0x378   : > { %4364 = vmatmul.mubr.msk.f32.vlgmr.msra.gmra.mrb[120].mxu0 %vm1024_vm1, %v5342_v7  ;;  %4368 = vmatmul.mubr.msk.f32.vlgmr.msra.gmra.mrb[120].mxu1 %vm1024_vm1, %v5342_v7  ;;  %v4710_v7 = vmov 4  }
 0x379   : > { %3259 = vmatprep.mubr.f32.mxu0 %v4704_v6  ;;  %3348 = vmatprep.mubr.f32.mxu1 %v4704_v6 }
 0x37a   : > { %4691 = vset.pattern.permute.xlu0 %v4710_v7 }
 0x37b   : > { %4113 = vperm.xlu0 %4691, %v5306_v59  }
 0x37c   : > { %4365 = vmatmul.mubr.msk.f32.gmra.mrb[122].mxu0 %vm1024_vm1, %v5358_v61  ;;  %4369 = vmatmul.mubr.msk.f32.gmra.mrb[122].mxu1 %vm1024_vm1, %v5358_v61  ;;  %v5501_v61 = vpop.permute.xlu1 %2628 }
 0x37d   : > { %3265 = vmatprep.mubr.f32.mxu0 %v4704_v6  ;;  %3354 = vmatprep.mubr.f32.mxu1 %v4704_v6 }
 0x380   : > { %4366 = vmatmul.mubr.msk.f32.gmra.mrb[124].mxu0 %vm1024_vm1, %v5371_v20  ;;  %4370 = vmatmul.mubr.msk.f32.gmra.mrb[124].mxu1 %vm1024_vm1, %v5371_v20  ;;  %v5507_v45 = vpop.permute.xlu1 %2636 }
 0x381   : > { %3271 = vmatprep.mubr.f32.mxu0 %v4704_v6  ;;  %3360 = vmatprep.mubr.f32.mxu1 %v4704_v6 }
 0x384   : > { %4367 = vmatmul.mubr.msk.f32.gmra.mrb[126].mxu0 %vm1024_vm1, %v5388_v37  ;;  %4371 = vmatmul.mubr.msk.f32.gmra.mrb[126].mxu1 %vm1024_vm1, %v5388_v37  ;;  %v5515_v28 = vpop.permute.xlu1 %2640 }
 0x385   : > { %3512 = vmatprep.mubr.f32.mxu0 %v4704_v6  ;;  %3595 = vmatprep.mubr.f32.mxu1 %v4704_v6 }
 0x418   : > { %v2721_v20 = vpop.f32.mrb[96].mxu0  ;;  %v2810_v44 = vpop.f32.mrb[96].mxu1 }
 0x419   : > { %v2723_v17 = vpop.f32.mrb[97].mxu0  ;;  %v2812_v41 = vpop.f32.mrb[97].mxu1  ;;  %v2722_v42 = vadd.f32 %v2721_v20, %v5501_v61  ;;  %v2811_v37 = vadd.f32 %v2810_v44, %v5501_v61 }
 0x41a   : > { %v2724_v8 = vadd.f32 %v2723_v17, %v5501_v61  ;;  %v2813_v9 = vadd.f32 %v2812_v41, %v5501_v61 }
 0x41b   : > { %v3367_v55 = vmax.f32 %v2722_v42, 0.0  ;;  %v3369_v56 = vmax.f32 %v2811_v37, 0.0  ;;  %v5531_v37 = vld [vmem:[%s5723_s1 + $0x60] sm:$0xff] }
 0x41c   : > { %v2727_v10 = vpop.f32.mrb[98].mxu0  ;;  %v2816_v59 = vpop.f32.mrb[98].mxu1  ;;  %v3368_v58 = vmax.f32 %v2724_v8, 0.0  ;;  %v3370_v62 = vmax.f32 %v2813_v9, 0.0 }
 0x41d   : > { %v2729_v48 = vpop.f32.mrb[99].mxu0  ;;  %v2818_v50 = vpop.f32.mrb[99].mxu1  ;;  %v2728_v51 = vadd.f32 %v2727_v10, %v5503_v36  ;;  %v2817_v52 = vadd.f32 %v2816_v59, %v5503_v36 }
 0x41e   : > { %v2730_v53 = vadd.f32 %v2729_v48, %v5503_v36  ;;  %v2819_v54 = vadd.f32 %v2818_v50, %v5503_v36 }
 0x41f   : > { %v3383_v63 = vmax.f32 %v2728_v51, 0.0  ;;  %v3385_v27 = vmax.f32 %v2817_v52, 0.0 }
 0x420   : > { %v3384_v60 = vmax.f32 %v2730_v53, 0.0  ;;  %v3386_v0 = vmax.f32 %v2819_v54, 0.0  ;;  %v2733_v1 = vpop.f32.mrb[100].mxu0  ;;  %v2822_v2 = vpop.f32.mrb[100].mxu1 }
 0x421   : > { %v2735_v43 = vpop.f32.mrb[101].mxu0  ;;  %v2824_v3 = vpop.f32.mrb[101].mxu1  ;;  %v4606_v4 = vpack.c.bf16 %v3383_v63, %v3367_v55  ;;  %v4614_v5 = vpack.c.bf16 %v3385_v27, %v3369_v56  ;;  %v2734_v14 = vadd.f32 %v2733_v1, %v5507_v45  ;;  %v2823_v15 = vadd.f32 %v2822_v2, %v5507_v45 }
 0x422   : > { %v4604_v11 = vpack.c.bf16 %v3384_v60, %v3368_v58  ;;  %v4612_v34 = vpack.c.bf16 %v3386_v0, %v3370_v62  ;;  %v2736_v18 = vadd.f32 %v2735_v43, %v5507_v45  ;;  %v2825_v19 = vadd.f32 %v2824_v3, %v5507_v45  ;;  %v5547_v62 = vld [vmem:[%s5723_s1 + $0x68] sm:$0xff] }
 0x423   : > { %v3399_v29 = vmax.f32 %v2734_v14, 0.0  ;;  %v3401_v30 = vmax.f32 %v2823_v15, 0.0 }
 0x424   : > { %v2739_v21 = vpop.f32.mrb[102].mxu0  ;;  %v2828_v22 = vpop.f32.mrb[102].mxu1  ;;  %4605 = vmatprep.subr.bf16.mxu0 %v4604_v11  ;;  %4613 = vmatprep.subr.bf16.mxu1 %v4612_v34  ;;  %v3400_v57 = vmax.f32 %v2736_v18, 0.0  ;;  %v3402_v33 = vmax.f32 %v2825_v19, 0.0  ;;  %v5560_v19 = vld [vmem:[%s5723_s1 + $0x70] sm:$0xff] }
 0x425   : > { %v2740_v23 = vadd.f32 %v2739_v21, %v5515_v28  ;;  %v2829_v24 = vadd.f32 %v2828_v22, %v5515_v28  ;;  %v2741_v25 = vpop.f32.mrb[103].mxu0  ;;  %v2830_v26 = vpop.f32.mrb[103].mxu1  ;;  %4607 = vmatpush1.bf16.msra.mxu0 %v4606_v4  ;;  %4615 = vmatpush1.bf16.msra.mxu1 %v4614_v5 }
 0x426   : > { %v2742_v47 = vadd.f32 %v2741_v25, %v5515_v28  ;;  %v2831_v49 = vadd.f32 %v2830_v26, %v5515_v28 }
 0x427   : > { %v3415_v31 = vmax.f32 %v2740_v23, 0.0  ;;  %v3417_v32 = vmax.f32 %v2829_v24, 0.0 }
 0x428   : > { %v3416_v35 = vmax.f32 %v2742_v47, 0.0  ;;  %v3418_v12 = vmax.f32 %v2831_v49, 0.0 }
 0x429   : > { %v4610_v38 = vpack.c.bf16 %v3415_v31, %v3399_v29  ;;  %v4618_v46 = vpack.c.bf16 %v3417_v32, %v3401_v30  ;;  %v2899_v16 = vpop.f32.mrb[104].mxu0 }
 0x42a   : > { %v4608_v13 = vpack.c.bf16 %v3416_v35, %v3400_v57  ;;  %v4616_v39 = vpack.c.bf16 %v3418_v12, %v3402_v33  ;;  %v2988_v40 = vpop.f32.mrb[104].mxu1  ;;  %v2901_v7 = vpop.f32.mrb[105].mxu0  ;;  %v2900_v44 = vadd.f32 %v2899_v16, %v5501_v61  ;;  %v5577_v35 = vld [vmem:[%s5723_s1 + $0x78] sm:$0xff] }
 0x42b   : > { %v2990_v20 = vpop.f32.mrb[105].mxu1  ;;  %v2989_v17 = vadd.f32 %v2988_v40, %v5501_v61  ;;  %v2902_v41 = vadd.f32 %v2901_v7, %v5501_v61 }
 0x42c   : > { %4609 = vmatprep.subr.bf16.mxu0 %v4608_v13  ;;  %4617 = vmatprep.subr.bf16.mxu1 %v4616_v39  ;;  %v2991_v8 = vadd.f32 %v2990_v20, %v5501_v61  ;;  %v3371_v52 = vmax.f32 %v2900_v44, 0.0 }
 0x42d   : > { %v2905_v42 = vpop.f32.mrb[106].mxu0  ;;  %4611 = vmatpush1.bf16.msra.mxu0 %v4610_v38  ;;  %4619 = vmatpush1.bf16.msra.mxu1 %v4618_v46  ;;  %v3373_v55 = vmax.f32 %v2989_v17, 0.0  ;;  %v3372_v56 = vmax.f32 %v2902_v41, 0.0 }
 0x42e   : > { %v2906_v9 = vadd.f32 %v2905_v42, %v5503_v36  ;;  %v2994_v10 = vpop.f32.mrb[106].mxu1  ;;  %v2907_v59 = vpop.f32.mrb[107].mxu0  ;;  %v3374_v60 = vmax.f32 %v2991_v8, 0.0 }
 0x42f   : > { %v2995_v48 = vadd.f32 %v2994_v10, %v5503_v36  ;;  %v2908_v50 = vadd.f32 %v2907_v59, %v5503_v36  ;;  %v2996_v51 = vpop.f32.mrb[107].mxu1 }
 0x430   : > { %v3387_v53 = vmax.f32 %v2906_v9, 0.0  ;;  %v2997_v54 = vadd.f32 %v2996_v51, %v5503_v36  ;;  %4376 = vmatmul.mubr.msk.f32.vlgmr.msra.gmra.mrb[128].mxu0 %vm1024_vm1, %v5531_v37  ;;  %4380 = vmatmul.mubr.msk.f32.vlgmr.msra.gmra.mrb[128].mxu1 %vm1024_vm1, %v5531_v37 }
 0x431   : > { %v3389_v63 = vmax.f32 %v2995_v48, 0.0  ;;  %v3388_v27 = vmax.f32 %v2908_v50, 0.0  ;;  %v2911_v58 = vpop.f32.mrb[108].mxu0  ;;  %3518 = vmatprep.mubr.f32.mxu0 %v4704_v6  ;;  %3601 = vmatprep.mubr.f32.mxu1 %v4704_v6 }
 0x432   : > { %v4622_v0 = vpack.c.bf16 %v3387_v53, %v3371_v52  ;;  %v3390_v1 = vmax.f32 %v2997_v54, 0.0  ;;  %v3000_v2 = vpop.f32.mrb[108].mxu1  ;;  %v2913_v43 = vpop.f32.mrb[109].mxu0  ;;  %v2912_v34 = vadd.f32 %v2911_v58, %v5507_v45 }
 0x433   : > { %v4630_v3 = vpack.c.bf16 %v3389_v63, %v3373_v55  ;;  %v4620_v4 = vpack.c.bf16 %v3388_v27, %v3372_v56  ;;  %v3002_v5 = vpop.f32.mrb[109].mxu1  ;;  %v3001_v14 = vadd.f32 %v3000_v2, %v5507_v45  ;;  %v2914_v15 = vadd.f32 %v2913_v43, %v5507_v45 }
 0x434   : > { %v4628_v11 = vpack.c.bf16 %v3390_v1, %v3374_v60  ;;  %4377 = vmatmul.mubr.msk.f32.gmra.mrb[130].mxu0 %vm1024_vm1, %v5547_v62  ;;  %4381 = vmatmul.mubr.msk.f32.gmra.mrb[130].mxu1 %vm1024_vm1, %v5547_v62  ;;  %v3003_v21 = vadd.f32 %v3002_v5, %v5507_v45  ;;  %v3403_v49 = vmax.f32 %v2912_v34, 0.0 }
 0x435   : > { %v2917_v18 = vpop.f32.mrb[110].mxu0  ;;  %4621 = vmatprep.subr.bf16.mxu0 %v4620_v4  ;;  %3522 = vmatprep.mubr.f32.mxu0 %v4704_v6  ;;  %v3405_v31 = vmax.f32 %v3001_v14, 0.0  ;;  %v3404_v32 = vmax.f32 %v2914_v15, 0.0 }
 0x436   : > { %v2918_v22 = vadd.f32 %v2917_v18, %v5515_v28  ;;  %v3006_v23 = vpop.f32.mrb[110].mxu1  ;;  %4629 = vmatprep.subr.bf16.mxu1 %v4628_v11  ;;  %v2919_v24 = vpop.f32.mrb[111].mxu0  ;;  %4623 = vmatpush1.bf16.msra.mxu0 %v4622_v0  ;;  %v3406_v12 = vmax.f32 %v3003_v21, 0.0 }
 0x437   : > { %v3007_v25 = vadd.f32 %v3006_v23, %v5515_v28  ;;  %v2920_v26 = vadd.f32 %v2919_v24, %v5515_v28  ;;  %v3008_v47 = vpop.f32.mrb[111].mxu1  ;;  %4631 = vmatpush1.bf16.msra.mxu1 %v4630_v3  ;;  %3605 = vmatprep.mubr.f32.mxu1 %v4704_v6 }
 0x438   : > { %v3419_v29 = vmax.f32 %v2918_v22, 0.0  ;;  %v3009_v30 = vadd.f32 %v3008_v47, %v5515_v28  ;;  %4378 = vmatmul.mubr.msk.f32.gmra.mrb[132].mxu0 %vm1024_vm1, %v5560_v19  ;;  %4382 = vmatmul.mubr.msk.f32.gmra.mrb[132].mxu1 %vm1024_vm1, %v5560_v19 }
 0x439   : > { %v3421_v57 = vmax.f32 %v3007_v25, 0.0  ;;  %v3420_v33 = vmax.f32 %v2920_v26, 0.0  ;;  %3526 = vmatprep.mubr.f32.mxu0 %v4704_v6  ;;  %3609 = vmatprep.mubr.f32.mxu1 %v4704_v6 }
 0x43a   : > { %v4626_v38 = vpack.c.bf16 %v3419_v29, %v3403_v49  ;;  %v3422_v46 = vmax.f32 %v3009_v30, 0.0  ;;  %v3077_v16 = vpop.f32.mrb[112].mxu0 }
 0x43b   : > { %v4634_v13 = vpack.c.bf16 %v3421_v57, %v3405_v31  ;;  %v4624_v39 = vpack.c.bf16 %v3420_v33, %v3404_v32  ;;  %v3166_v40 = vpop.f32.mrb[112].mxu1  ;;  %v3079_v7 = vpop.f32.mrb[113].mxu0  ;;  %v3078_v17 = vadd.f32 %v3077_v16, %v5501_v61 }
 0x43c   : > { %v4632_v20 = vpack.c.bf16 %v3422_v46, %v3406_v12  ;;  %v3168_v44 = vpop.f32.mrb[113].mxu1  ;;  %4379 = vmatmul.mubr.msk.f32.gmra.mrb[134].mxu0 %vm1024_vm1, %v5577_v35  ;;  %4383 = vmatmul.mubr.msk.f32.gmra.mrb[134].mxu1 %vm1024_vm1, %v5577_v35  ;;  %v3167_v41 = vadd.f32 %v3166_v40, %v5501_v61  ;;  %v3080_v42 = vadd.f32 %v3079_v7, %v5501_v61 }
 0x43d   : > { %4625 = vmatprep.subr.bf16.mxu0 %v4624_v39  ;;  %3678 = vmatprep.mubr.f32.mxu0 %v4704_v6  ;;  %v3169_v9 = vadd.f32 %v3168_v44, %v5501_v61  ;;  %v3375_v53 = vmax.f32 %v3078_v17, 0.0 }
 0x43e   : > { %v3083_v8 = vpop.f32.mrb[114].mxu0  ;;  %4633 = vmatprep.subr.bf16.mxu1 %v4632_v20  ;;  %4627 = vmatpush1.bf16.msra.mxu0 %v4626_v38  ;;  %v3377_v56 = vmax.f32 %v3167_v41, 0.0  ;;  %v3376_v63 = vmax.f32 %v3080_v42, 0.0 }
 0x43f   : > { %v3084_v10 = vadd.f32 %v3083_v8, %v5503_v36  ;;  %v3172_v59 = vpop.f32.mrb[114].mxu1  ;;  %v3085_v48 = vpop.f32.mrb[115].mxu0  ;;  %4635 = vmatpush1.bf16.msra.mxu1 %v4634_v13  ;;  %3761 = vmatprep.mubr.f32.mxu1 %v4704_v6  ;;  %v3378_v0 = vmax.f32 %v3169_v9, 0.0 }
 0x440   : > { %v3173_v50 = vadd.f32 %v3172_v59, %v5503_v36  ;;  %v3086_v51 = vadd.f32 %v3085_v48, %v5503_v36  ;;  %v3174_v52 = vpop.f32.mrb[115].mxu1 }
 0x441   : > { %v3391_v54 = vmax.f32 %v3084_v10, 0.0  ;;  %v3175_v55 = vadd.f32 %v3174_v52, %v5503_v36  ;;  %4384 = vmatmul.mubr.msk.f32.vlgmr.msra.gmra.mrb[136].mxu0 %vm1024_vm1, %v5531_v37 }
 0x442   : > { %v3393_v27 = vmax.f32 %v3173_v50, 0.0  ;;  %v3392_v58 = vmax.f32 %v3086_v51, 0.0  ;;  %v3089_v60 = vpop.f32.mrb[116].mxu0  ;;  %4388 = vmatmul.mubr.msk.f32.vlgmr.msra.gmra.mrb[136].mxu1 %vm1024_vm1, %v5531_v37  ;;  %3684 = vmatprep.mubr.f32.mxu0 %v4704_v6 }
 0x443   : > { %v4638_v1 = vpack.c.bf16 %v3391_v54, %v3375_v53  ;;  %v3394_v2 = vmax.f32 %v3175_v55, 0.0  ;;  %v3178_v43 = vpop.f32.mrb[116].mxu1  ;;  %v3091_v3 = vpop.f32.mrb[117].mxu0  ;;  %3767 = vmatprep.mubr.f32.mxu1 %v4704_v6  ;;  %v3090_v14 = vadd.f32 %v3089_v60, %v5507_v45 }
 0x444   : > { %v4646_v4 = vpack.c.bf16 %v3393_v27, %v3377_v56  ;;  %v4636_v5 = vpack.c.bf16 %v3392_v58, %v3376_v63  ;;  %v3180_v11 = vpop.f32.mrb[117].mxu1  ;;  %v3179_v15 = vadd.f32 %v3178_v43, %v5507_v45  ;;  %v3092_v18 = vadd.f32 %v3091_v3, %v5507_v45 }
 0x445   : > { %v4644_v34 = vpack.c.bf16 %v3394_v2, %v3378_v0  ;;  %4385 = vmatmul.mubr.msk.f32.gmra.mrb[138].mxu0 %vm1024_vm1, %v5547_v62  ;;  %v3181_v22 = vadd.f32 %v3180_v11, %v5507_v45  ;;  %v3407_v29 = vmax.f32 %v3090_v14, 0.0 }
 0x446   : > { %v3095_v21 = vpop.f32.mrb[118].mxu0  ;;  %4637 = vmatprep.subr.bf16.mxu0 %v4636_v5  ;;  %4389 = vmatmul.mubr.msk.f32.gmra.mrb[138].mxu1 %vm1024_vm1, %v5547_v62  ;;  %v3409_v32 = vmax.f32 %v3179_v15, 0.0  ;;  %v3408_v57 = vmax.f32 %v3092_v18, 0.0 }
 0x447   : > { %v3096_v23 = vadd.f32 %v3095_v21, %v5515_v28  ;;  %v3184_v24 = vpop.f32.mrb[118].mxu1  ;;  %4645 = vmatprep.subr.bf16.mxu1 %v4644_v34  ;;  %v3097_v25 = vpop.f32.mrb[119].mxu0  ;;  %4639 = vmatpush1.bf16.msra.mxu0 %v4638_v1  ;;  %v3410_v38 = vmax.f32 %v3181_v22, 0.0 }
 0x448   : > { %v3185_v26 = vadd.f32 %v3184_v24, %v5515_v28  ;;  %v3098_v47 = vadd.f32 %v3097_v25, %v5515_v28  ;;  %v3186_v49 = vpop.f32.mrb[119].mxu1  ;;  %4647 = vmatpush1.bf16.msra.mxu1 %v4646_v4  ;;  %3688 = vmatprep.mubr.f32.mxu0 %v4704_v6 }
 0x449   : > { %v3423_v30 = vmax.f32 %v3096_v23, 0.0  ;;  %v3187_v31 = vadd.f32 %v3186_v49, %v5515_v28  ;;  %3771 = vmatprep.mubr.f32.mxu1 %v4704_v6  ;;  %4386 = vmatmul.mubr.msk.f32.gmra.mrb[140].mxu0 %vm1024_vm1, %v5560_v19 }
 0x44a   : > { %v3425_v33 = vmax.f32 %v3185_v26, 0.0  ;;  %v3424_v12 = vmax.f32 %v3098_v47, 0.0  ;;  %4390 = vmatmul.mubr.msk.f32.gmra.mrb[140].mxu1 %vm1024_vm1, %v5560_v19  ;;  %3692 = vmatprep.mubr.f32.mxu0 %v4704_v6 }
 0x44b   : > { %v4642_v46 = vpack.c.bf16 %v3423_v30, %v3407_v29  ;;  %v3426_v16 = vmax.f32 %v3187_v31, 0.0  ;;  %v3255_v13 = vpop.f32.mrb[120].mxu0  ;;  %v3344_v39 = vpop.f32.mrb[120].mxu1  ;;  %3775 = vmatprep.mubr.f32.mxu1 %v4704_v6 }
 0x44c   : > { %v4650_v40 = vpack.c.bf16 %v3425_v33, %v3409_v32  ;;  %v4640_v7 = vpack.c.bf16 %v3424_v12, %v3408_v57  ;;  %v3257_v20 = vpop.f32.mrb[121].mxu0  ;;  %v3346_v44 = vpop.f32.mrb[121].mxu1  ;;  %v3256_v41 = vadd.f32 %v3255_v13, %v5501_v61  ;;  %v3345_v42 = vadd.f32 %v3344_v39, %v5501_v61 }
 0x44d   : > { %v4648_v17 = vpack.c.bf16 %v3426_v16, %v3410_v38  ;;  %4387 = vmatmul.mubr.msk.f32.gmra.mrb[142].mxu0 %vm1024_vm1, %v5577_v35  ;;  %v3258_v8 = vadd.f32 %v3257_v20, %v5501_v61  ;;  %v3347_v9 = vadd.f32 %v3346_v44, %v5501_v61 }
 0x44e   : > { %4641 = vmatprep.subr.bf16.mxu0 %v4640_v7  ;;  %4391 = vmatmul.mubr.msk.f32.gmra.mrb[142].mxu1 %vm1024_vm1, %v5577_v35  ;;  %v3379_v61 = vmax.f32 %v3256_v41, 0.0  ;;  %v3381_v55 = vmax.f32 %v3345_v42, 0.0 }
 0x44f   : > { %v3261_v10 = vpop.f32.mrb[122].mxu0  ;;  %v3350_v59 = vpop.f32.mrb[122].mxu1  ;;  %4649 = vmatprep.subr.bf16.mxu1 %v4648_v17  ;;  %4643 = vmatpush1.bf16.msra.mxu0 %v4642_v46  ;;  %v3380_v27 = vmax.f32 %v3258_v8, 0.0  ;;  %v3382_v58 = vmax.f32 %v3347_v9, 0.0 }
 0x450   : > { %v3262_v48 = vadd.f32 %v3261_v10, %v5503_v36  ;;  %v3351_v50 = vadd.f32 %v3350_v59, %v5503_v36  ;;  %v3263_v51 = vpop.f32.mrb[123].mxu0  ;;  %v3352_v52 = vpop.f32.mrb[123].mxu1  ;;  %4651 = vmatpush1.bf16.msra.mxu1 %v4650_v40  ;;  %3844 = vmatprep.mubr.f32.mxu0 %v4704_v6 }
 0x451   : > { %v3264_v53 = vadd.f32 %v3263_v51, %v5503_v36  ;;  %v3353_v54 = vadd.f32 %v3352_v52, %v5503_v36  ;;  %3927 = vmatprep.mubr.f32.mxu1 %v4704_v6 }
 0x452   : > { %v3395_v56 = vmax.f32 %v3262_v48, 0.0  ;;  %v3397_v63 = vmax.f32 %v3351_v50, 0.0  ;;  %4392 = vmatmul.mubr.msk.f32.vlgmr.msra.gmra.mrb[144].mxu0 %vm1024_vm1, %v5531_v37 }
 0x453   : > { %v3396_v60 = vmax.f32 %v3264_v53, 0.0  ;;  %v3398_v0 = vmax.f32 %v3353_v54, 0.0  ;;  %v3267_v1 = vpop.f32.mrb[124].mxu0  ;;  %v3356_v2 = vpop.f32.mrb[124].mxu1  ;;  %4396 = vmatmul.mubr.msk.f32.vlgmr.msra.gmra.mrb[144].mxu1 %vm1024_vm1, %v5531_v37  ;;  %3850 = vmatprep.mubr.f32.mxu0 %v4704_v6 }
 0x454   : > { %v4654_v36 = vpack.c.bf16 %v3395_v56, %v3379_v61  ;;  %v4662_v43 = vpack.c.bf16 %v3397_v63, %v3381_v55  ;;  %v3269_v3 = vpop.f32.mrb[125].mxu0  ;;  %v3358_v4 = vpop.f32.mrb[125].mxu1  ;;  %3933 = vmatprep.mubr.f32.mxu1 %v4704_v6  ;;  %v3268_v34 = vadd.f32 %v3267_v1, %v5507_v45  ;;  %v3357_v14 = vadd.f32 %v3356_v2, %v5507_v45 }
 0x455   : > { %v4652_v5 = vpack.c.bf16 %v3396_v60, %v3380_v27  ;;  %v4660_v11 = vpack.c.bf16 %v3398_v0, %v3382_v58  ;;  %v3270_v15 = vadd.f32 %v3269_v3, %v5507_v45  ;;  %v3359_v18 = vadd.f32 %v3358_v4, %v5507_v45 }
 0x456   : > { %4393 = vmatmul.mubr.msk.f32.gmra.mrb[146].mxu0 %vm1024_vm1, %v5547_v62  ;;  %v3411_v45 = vmax.f32 %v3268_v34, 0.0  ;;  %v3413_v29 = vmax.f32 %v3357_v14, 0.0 }
 0x457   : > { %v3273_v21 = vpop.f32.mrb[126].mxu0  ;;  %v3362_v22 = vpop.f32.mrb[126].mxu1  ;;  %4653 = vmatprep.subr.bf16.mxu0 %v4652_v5  ;;  %4661 = vmatprep.subr.bf16.mxu1 %v4660_v11  ;;  %v3412_v32 = vmax.f32 %v3270_v15, 0.0  ;;  %v3414_v57 = vmax.f32 %v3359_v18, 0.0 }
 0x458   : > { %v3274_v23 = vadd.f32 %v3273_v21, %v5515_v28  ;;  %v3363_v24 = vadd.f32 %v3362_v22, %v5515_v28  ;;  %v3275_v25 = vpop.f32.mrb[127].mxu0  ;;  %v3364_v26 = vpop.f32.mrb[127].mxu1  ;;  %4655 = vmatpush1.bf16.msra.mxu0 %v4654_v36  ;;  %4663 = vmatpush1.bf16.msra.mxu1 %v4662_v43 }
 0x459   : > { %v3276_v47 = vadd.f32 %v3275_v25, %v5515_v28  ;;  %v3365_v49 = vadd.f32 %v3364_v26, %v5515_v28  ;;  %4397 = vmatmul.mubr.msk.f32.gmra.mrb[146].mxu1 %vm1024_vm1, %v5547_v62  ;;  %3854 = vmatprep.mubr.f32.mxu0 %v4704_v6 }
 0x45a   : > { %v3427_v30 = vmax.f32 %v3274_v23, 0.0  ;;  %v3429_v31 = vmax.f32 %v3363_v24, 0.0  ;;  %3937 = vmatprep.mubr.f32.mxu1 %v4704_v6  ;;  %4394 = vmatmul.mubr.msk.f32.gmra.mrb[148].mxu0 %vm1024_vm1, %v5560_v19 }
 0x45b   : > { %v3428_v33 = vmax.f32 %v3276_v47, 0.0  ;;  %v3430_v12 = vmax.f32 %v3365_v49, 0.0  ;;  %3858 = vmatprep.mubr.f32.mxu0 %v4704_v6 }
 0x45c   : > { %v4658_v28 = vpack.c.bf16 %v3427_v30, %v3411_v45  ;;  %v4666_v38 = vpack.c.bf16 %v3429_v31, %v3413_v29 }
 0x45d   : > { %v4656_v46 = vpack.c.bf16 %v3428_v33, %v3412_v32  ;;  %v4664_v16 = vpack.c.bf16 %v3430_v12, %v3414_v57  ;;  %4398 = vmatmul.mubr.msk.f32.gmra.mrb[148].mxu1 %vm1024_vm1, %v5560_v19 }
 0x45e   : > { %3941 = vmatprep.mubr.f32.mxu1 %v4704_v6  ;;  %4395 = vmatmul.mubr.msk.f32.gmra.mrb[150].mxu0 %vm1024_vm1, %v5577_v35 }
 0x45f   : > { %4657 = vmatprep.subr.bf16.mxu0 %v4656_v46  ;;  %4665 = vmatprep.subr.bf16.mxu1 %v4664_v16 }
 0x460   : > { %4659 = vmatpush1.bf16.msra.mxu0 %v4658_v28  ;;  %4667 = vmatpush1.bf16.msra.mxu1 %v4666_v38 }
 0x461   : > { %4399 = vmatmul.mubr.msk.f32.gmra.mrb[150].mxu1 %vm1024_vm1, %v5577_v35  ;;  %4010 = vmatprep.mubr.f32.mxu0 %v4704_v6 }
 0x462   : > { %4093 = vmatprep.mubr.f32.mxu1 %v4704_v6 }
 0x463   : > { %4400 = vmatmul.mubr.msk.f32.vlgmr.msra.gmra.mrb[152].mxu0 %vm1024_vm1, %v5531_v37 }
 0x464   : > { %4016 = vmatprep.mubr.f32.mxu0 %v4704_v6 }
 0x465   : > { %4404 = vmatmul.mubr.msk.f32.vlgmr.msra.gmra.mrb[152].mxu1 %vm1024_vm1, %v5531_v37  ;;  %v5687_v37 = vpop.permute.xlu0 %4113 }
 0x466   : > { %4099 = vmatprep.mubr.f32.mxu1 %v4704_v6 }
 0x467   : > { %4401 = vmatmul.mubr.msk.f32.gmra.mrb[154].mxu0 %vm1024_vm1, %v5547_v62 }
 0x468   : > { %4020 = vmatprep.mubr.f32.mxu0 %v4704_v6 }
 0x469   : > { %4405 = vmatmul.mubr.msk.f32.gmra.mrb[154].mxu1 %vm1024_vm1, %v5547_v62 }
 0x46a   : > { %4103 = vmatprep.mubr.f32.mxu1 %v4704_v6 }
 0x46b   : > { %4402 = vmatmul.mubr.msk.f32.gmra.mrb[156].mxu0 %vm1024_vm1, %v5560_v19 }
 0x46c   : > { %4024 = vmatprep.mubr.f32.mxu0 %v4704_v6 }
 0x46d   : > { %4406 = vmatmul.mubr.msk.f32.gmra.mrb[156].mxu1 %vm1024_vm1, %v5560_v19 }
 0x46e   : > { %4107 = vmatprep.mubr.f32.mxu1 %v4704_v6 }
 0x46f   : > { %4403 = vmatmul.mubr.msk.f32.gmra.mrb[158].mxu0 %vm1024_vm1, %v5577_v35 }
 0x471   : > { %4407 = vmatmul.mubr.msk.f32.gmra.mrb[158].mxu1 %vm1024_vm1, %v5577_v35 }
 0x503   : > { %v3514_v62 = vpop.f32.mrb[128].mxu0  ;;  %v3597_v13 = vpop.f32.mrb[128].mxu1 }
 0x504   : > { %v3516_v39 = vpop.f32.mrb[129].mxu0  ;;  %v3599_v40 = vpop.f32.mrb[129].mxu1  ;;  %v4116_v7 = vadd.f32 %v5687_v37, %v3514_v62  ;;  %v4118_v20 = vadd.f32 %v5687_v37, %v3597_v13 }
 0x505   : > { %v4117_v19 = vadd.f32 %v5687_v37, %v3516_v39  ;;  %v4119_v6 = vadd.f32 %v5687_v37, %v3599_v40 }
 0x507   : > { %v4148_v35 = vcombine.low %v4116_v7, %v4117_v19  ;;  %v4149_v44 = vcombine.low %v4118_v20, %v4119_v6  ;;  %v3520_v17 = vpop.f32.mrb[130].mxu0  ;;  %v3603_v41 = vpop.f32.mrb[130].mxu1 }
 0x508   : > { %v3521_v42 = vpop.f32.mrb[131].mxu0  ;;  %v3604_v8 = vpop.f32.mrb[131].mxu1 }
 0x509   : > { %4164 = vst [vmem:[%s5697_s10] sm:$0x77] %v4148_v35  ;;  %4165 = vst [vmem:[%s5697_s10 + $0x8] sm:$0x77] %v4149_v44 }
 0x50b   : > { %v3524_v9 = vpop.f32.mrb[132].mxu0  ;;  %v3607_v10 = vpop.f32.mrb[132].mxu1 }
 0x50c   : > { %v3525_v59 = vpop.f32.mrb[133].mxu0  ;;  %v3608_v48 = vpop.f32.mrb[133].mxu1 }
 0x50f   : > { %v3528_v50 = vpop.f32.mrb[134].mxu0  ;;  %v3611_v51 = vpop.f32.mrb[134].mxu1 }
 0x510   : > { %v3529_v52 = vpop.f32.mrb[135].mxu0  ;;  %v3612_v53 = vpop.f32.mrb[135].mxu1 }
 0x514   : > { %v3680_v54 = vpop.f32.mrb[136].mxu0 }
 0x515   : > { %v4120_v61 = vadd.f32 %v5687_v37, %v3680_v54  ;;  %v3763_v55 = vpop.f32.mrb[136].mxu1  ;;  %v3682_v56 = vpop.f32.mrb[137].mxu0 }
 0x516   : > { %v4122_v63 = vadd.f32 %v5687_v37, %v3763_v55  ;;  %v4121_v27 = vadd.f32 %v5687_v37, %v3682_v56  ;;  %v3765_v58 = vpop.f32.mrb[137].mxu1 }
 0x517   : > { %v4123_v60 = vadd.f32 %v5687_v37, %v3765_v58 }
 0x518   : > { %v4150_v0 = vcombine.low %v4120_v61, %v4121_v27  ;;  %v3686_v1 = vpop.f32.mrb[138].mxu0 }
 0x519   : > { %v4151_v2 = vcombine.low %v4122_v63, %v4123_v60  ;;  %v3769_v36 = vpop.f32.mrb[138].mxu1  ;;  %v3687_v43 = vpop.f32.mrb[139].mxu0 }
 0x51a   : > { %4166 = vst [vmem:[%s5697_s10 + $0x10] sm:$0x77] %v4150_v0  ;;  %v3770_v3 = vpop.f32.mrb[139].mxu1 }
 0x51b   : > { %4167 = vst [vmem:[%s5697_s10 + $0x18] sm:$0x77] %v4151_v2 }
 0x51c   : > { %v3690_v4 = vpop.f32.mrb[140].mxu0 }
 0x51d   : > { %v3773_v5 = vpop.f32.mrb[140].mxu1  ;;  %v3691_v11 = vpop.f32.mrb[141].mxu0 }
 0x51e   : > { %v3774_v34 = vpop.f32.mrb[141].mxu1 }
 0x520   : > { %v3694_v14 = vpop.f32.mrb[142].mxu0 }
 0x521   : > { %v3777_v15 = vpop.f32.mrb[142].mxu1  ;;  %v3695_v18 = vpop.f32.mrb[143].mxu0 }
 0x522   : > { %v3778_v21 = vpop.f32.mrb[143].mxu1 }
 0x525   : > { %v3846_v22 = vpop.f32.mrb[144].mxu0 }
 0x526   : > { %v4124_v23 = vadd.f32 %v5687_v37, %v3846_v22  ;;  %v3929_v24 = vpop.f32.mrb[144].mxu1  ;;  %v3848_v25 = vpop.f32.mrb[145].mxu0 }
 0x527   : > { %v4126_v26 = vadd.f32 %v5687_v37, %v3929_v24  ;;  %v4125_v47 = vadd.f32 %v5687_v37, %v3848_v25  ;;  %v3931_v49 = vpop.f32.mrb[145].mxu1 }
 0x528   : > { %v4127_v45 = vadd.f32 %v5687_v37, %v3931_v49 }
 0x529   : > { %v4152_v29 = vcombine.low %v4124_v23, %v4125_v47  ;;  %v3852_v30 = vpop.f32.mrb[146].mxu0 }
 0x52a   : > { %v4153_v31 = vcombine.low %v4126_v26, %v4127_v45  ;;  %v3853_v32 = vpop.f32.mrb[147].mxu0 }
 0x52b   : > { %4168 = vst [vmem:[%s5697_s10 + $0x20] sm:$0x77] %v4152_v29 }
 0x52c   : > { %4169 = vst [vmem:[%s5697_s10 + $0x28] sm:$0x77] %v4153_v31  ;;  %v3935_v57 = vpop.f32.mrb[146].mxu1 }
 0x52d   : > { %v3936_v33 = vpop.f32.mrb[147].mxu1  ;;  %v3856_v12 = vpop.f32.mrb[148].mxu0 }
 0x52e   : > { %v3857_v28 = vpop.f32.mrb[149].mxu0 }
 0x530   : > { %v3939_v38 = vpop.f32.mrb[148].mxu1 }
 0x531   : > { %v3940_v46 = vpop.f32.mrb[149].mxu1  ;;  %v3860_v16 = vpop.f32.mrb[150].mxu0 }
 0x532   : > { %v3861_v62 = vpop.f32.mrb[151].mxu0 }
 0x534   : > { %v3943_v13 = vpop.f32.mrb[150].mxu1 }
 0x535   : > { %v3944_v39 = vpop.f32.mrb[151].mxu1 }
 0x536   : > { %v4012_v40 = vpop.f32.mrb[152].mxu0 }
 0x537   : > { %v4128_v7 = vadd.f32 %v5687_v37, %v4012_v40  ;;  %v4014_v20 = vpop.f32.mrb[153].mxu0 }
 0x538   : > { %v4095_v19 = vpop.f32.mrb[152].mxu1  ;;  %v4129_v6 = vadd.f32 %v5687_v37, %v4014_v20 }
 0x539   : > { %v4130_v35 = vadd.f32 %v5687_v37, %v4095_v19  ;;  %v4097_v44 = vpop.f32.mrb[153].mxu1 }
 0x53a   : > { %v4154_v17 = vcombine.low %v4128_v7, %v4129_v6  ;;  %v4131_v41 = vadd.f32 %v5687_v37, %v4097_v44  ;;  %v4018_v42 = vpop.f32.mrb[154].mxu0 }
 0x53b   : > { %v4019_v8 = vpop.f32.mrb[155].mxu0 }
 0x53c   : > { %4170 = vst [vmem:[%s5697_s10 + $0x30] sm:$0x77] %v4154_v17  ;;  %v4155_v9 = vcombine.low %v4130_v35, %v4131_v41  ;;  %v4101_v10 = vpop.f32.mrb[154].mxu1 }
 0x53d   : > { %v4102_v59 = vpop.f32.mrb[155].mxu1 }
 0x53e   : > { %4171 = vst [vmem:[%s5697_s10 + $0x38] sm:$0x77] %v4155_v9  ;;  %v4022_v48 = vpop.f32.mrb[156].mxu0 }
 0x53f   : > { %v4023_v50 = vpop.f32.mrb[157].mxu0 }
 0x540   : > { %v4105_v51 = vpop.f32.mrb[156].mxu1 }
 0x541   : > { %v4106_v52 = vpop.f32.mrb[157].mxu1 }
 0x542   : > { %v4026_v53 = vpop.f32.mrb[158].mxu0 }
 0x543   : > { %v4027_v54 = vpop.f32.mrb[159].mxu0 }
 0x544   : > { %v4109_v61 = vpop.f32.mrb[158].mxu1 }
 0x545   : > { %v4110_v55 = vpop.f32.mrb[159].mxu1 }
 0x546 PF: > { %s13_s12 = sadd.s32 1, %s4702_s12  }
 0x547   : > { %p10_p4 = scmp.ge.s32.totalorder %s13_s12, 4  }
 0x549   :  { %12 = sbr.rel (!%p10_p4) target bundleno = 1 (0x1), region = 65 }

</bundles_post_ra>
